<compile_context>
chip_gen: v7x
topology: tpu7x:2x2x1
jax: 0.10.0
libtpu: 0.0.40
codegen_flags: <defaults>
</compile_context>

<pallas_src>
import functools

import jax
import jax.numpy as jnp
from jax.experimental import pallas as pl
from jax.experimental.pallas import tpu as pltpu


def _round_up(x, m):
    return (x + m - 1) // m * m


def _choose_vocab_tile(o_pad, cap=2048):
    """Largest multiple of 128 that divides o_pad and is <= cap (o_pad is a multiple of 128)."""
    t = min(o_pad, cap)
    while o_pad % t:
        t -= 128
    return t


def _vmem_limit_bytes(batch_pad, hidden_pad, o_tile):
    """Conservative footprint estimate (double-buffered streams) with headroom, clamped for v7x."""
    Bp, Hp, TO = batch_pad, hidden_pad, o_tile
    b = 0
    b += 2 * (Hp * 3 * Hp * 2) * 2              # w_ih_t, w_hh_t (bf16), double-buffered
    b += 2 * (3 * Hp * 4) * 2                   # GRU biases (f32)
    b += (Hp * TO * 2 + TO * 4) * 2             # w_out_t / b_out tile, double-buffered
    b += (Bp * Hp * 4) * 2                      # previous hidden
    b += (Bp * TO * 4) * 2                      # pred tile output, double-buffered
    b += (Bp * Hp * 4 + Bp * 4) * 2             # hnew + lse outputs
    b += Bp * Hp * 4 + Bp * Hp * 2 + 2 * Bp * 4 # scratch (x_buf f32, h_bf bf16, m, l)
    b = int(b * 1.5) + (4 << 20)                # headroom
    return max(16 << 20, min(b, 48 << 20))


def _decoder_kernel(
    tok_ref,                 # SMEM (Bp,)      int32  scalar-prefetched token ids
    emb_hbm,                 # ANY  (V, Hp)    f32    embedding table (stays in HBM)
    h_ref,                   # VMEM (Bp, Hp)   f32    previous hidden state
    wih_ref, whh_ref,        # VMEM (Hp, 3Hp)  bf16   GRU weights (pre-transposed)
    bih_ref, bhh_ref,        # VMEM (1, 3Hp)   f32    GRU biases
    wout_ref,                # VMEM (Hp, TO)   bf16   current vocab tile of output projection
    bout_ref,                # VMEM (1, TO)    f32    current vocab tile of output bias
    pred_ref,                # VMEM (Bp, TO)   f32    raw-logit tile (streamed back per step)
    lse_ref,                 # VMEM (Bp, 1)    f32    log-sum-exp (written on last step)
    hnew_ref,                # VMEM (Bp, Hp)   f32    new hidden (written on first step)
    x_buf,                   # VMEM (Bp, Hp)   f32    gathered embedding rows (scratch)
    h_bf,                    # VMEM (Bp, Hp)   bf16   new hidden, projection operand (scratch)
    m_scr, l_scr,            # VMEM (Bp, 1)    f32    online log-softmax running max / sum-exp
    dma_sems,                # DMA semaphores (Bp,)
    *, hidden_pad, batch_pad,
):
    j = pl.program_id(0)
    n_tiles = pl.num_programs(0)
    Hp = hidden_pad

    # ---- grid step 0: embedding gather (manual DMA, overlapped with the h-path) + GRU cell ---
    @pl.when(j == 0)
    def _():
        # Build all descriptors up front: the SMEM token-id reads happen before any .wait().
        copies = [
            pltpu.make_async_copy(
                emb_hbm.at[pl.ds(tok_ref[b], 1)],
                x_buf.at[pl.ds(b, 1)],
                dma_sems.at[b],
            )
            for b in range(batch_pad)
        ]
        for c in copies:
            c.start()

        h = h_ref[...]                        # (Bp, Hp) f32

        # h-path matmul does not need x -> runs while the row gathers are in flight.
        gh = jnp.dot(h.astype(jnp.bfloat16), whh_ref[...],
                     preferred_element_type=jnp.float32) + bhh_ref[...]    # (Bp, 3Hp) f32

        for c in copies:
            c.wait()

        x = x_buf[...]                        # (Bp, Hp) f32; dropout == identity (eval mode)
        gi = jnp.dot(x.astype(jnp.bfloat16), wih_ref[...],
                     preferred_element_type=jnp.float32) + bih_ref[...]    # (Bp, 3Hp) f32

        # GRU cell, PyTorch gate order (reset, update, new); f32 gate math.
        i_r, i_z, i_n = gi[:, :Hp], gi[:, Hp:2 * Hp], gi[:, 2 * Hp:]
        h_r, h_z, h_n = gh[:, :Hp], gh[:, Hp:2 * Hp], gh[:, 2 * Hp:]

        r = jax.nn.sigmoid(i_r + h_r)
        z = jax.nn.sigmoid(i_z + h_z)
        n = jnp.tanh(i_n + r * h_n)
        h_new = (1.0 - z) * n + z * h         # (Bp, Hp) f32

        hnew_ref[...] = h_new
        h_bf[...] = h_new.astype(jnp.bfloat16)
        m_scr[...] = jnp.full_like(m_scr, -1e30)
        l_scr[...] = jnp.zeros_like(l_scr)

    # ---- every grid step: one vocab tile of the output projection + online softmax stats -----
    logits = jnp.dot(h_bf[...], wout_ref[...],
                     preferred_element_type=jnp.float32) + bout_ref[...]   # (Bp, TO) f32
    pred_ref[...] = logits                    # raw logits; normalized by lse in the wrapper

    m_tile = jnp.max(logits, axis=-1, keepdims=True)
    m_new = jnp.maximum(m_scr[...], m_tile)
    l_scr[...] = (l_scr[...] * jnp.exp(m_scr[...] - m_new)
                  + jnp.sum(jnp.exp(logits - m_new), axis=-1, keepdims=True))
    m_scr[...] = m_new

    # ---- last grid step: emit the log-sum-exp ------------------------------------------------
    @pl.when(j == n_tiles - 1)
    def _():
        lse_ref[...] = m_scr[...] + jnp.log(l_scr[...])


def decoder_rnn_forward(params, input_token, hidden):
    """input_token: (B, 1) int32, hidden: (1, B, H) f32.
    Returns (prediction (B, O) log-probs, new hidden (1, B, H))."""
    B = input_token.shape[0]
    H = hidden.shape[2]
    O = params["embedding"].shape[0]          # true vocab size (gather source is unpadded in rows)
    Hp = params["w_ih_t"].shape[0]            # hidden padded to multiple of 128
    Op = params["w_out_t"].shape[1]           # vocab padded to multiple of 128
    Bp = _round_up(B, 8)
    TO = _choose_vocab_tile(Op)
    n_tiles = Op // TO

    tokens = jnp.pad(input_token[:, 0].astype(jnp.int32), (0, Bp - B))
    h_prev = jnp.pad(hidden[0].astype(jnp.float32), ((0, Bp - B), (0, Hp - H)))

    kernel = functools.partial(_decoder_kernel, hidden_pad=Hp, batch_pad=Bp)

    grid_spec = pltpu.PrefetchScalarGridSpec(
        num_scalar_prefetch=1,
        grid=(n_tiles,),
        in_specs=[
            pl.BlockSpec(memory_space=pl.ANY),                        # embedding table (HBM)
            pl.BlockSpec((Bp, Hp), lambda j, tok: (0, 0)),            # previous hidden
            pl.BlockSpec((Hp, 3 * Hp), lambda j, tok: (0, 0)),        # w_ih_t
            pl.BlockSpec((Hp, 3 * Hp), lambda j, tok: (0, 0)),        # w_hh_t
            pl.BlockSpec((1, 3 * Hp), lambda j, tok: (0, 0)),         # b_ih
            pl.BlockSpec((1, 3 * Hp), lambda j, tok: (0, 0)),         # b_hh
            pl.BlockSpec((Hp, TO), lambda j, tok: (0, j)),            # w_out_t vocab tile
            pl.BlockSpec((1, TO), lambda j, tok: (0, j)),             # b_out vocab tile
        ],
        out_specs=[
            pl.BlockSpec((Bp, TO), lambda j, tok: (0, j)),            # raw logits (streamed)
            pl.BlockSpec((Bp, 1), lambda j, tok: (0, 0)),             # log-sum-exp
            pl.BlockSpec((Bp, Hp), lambda j, tok: (0, 0)),            # new hidden
        ],
        scratch_shapes=[
            pltpu.VMEM((Bp, Hp), jnp.float32),     # gathered embedding rows
            pltpu.VMEM((Bp, Hp), jnp.bfloat16),    # new hidden (bf16) for the projection
            pltpu.VMEM((Bp, 1), jnp.float32),      # running max
            pltpu.VMEM((Bp, 1), jnp.float32),      # running sum-exp
            pltpu.SemaphoreType.DMA((Bp,)),        # per-row gather semaphores
        ],
    )

    logits_pad, lse_pad, h_new_pad = pl.pallas_call(
        kernel,
        out_shape=(
            jax.ShapeDtypeStruct((Bp, Op), jnp.float32),
            jax.ShapeDtypeStruct((Bp, 1), jnp.float32),
            jax.ShapeDtypeStruct((Bp, Hp), jnp.float32),
        ),
        grid_spec=grid_spec,
        compiler_params=pltpu.CompilerParams(
            dimension_semantics=("arbitrary",),          # vocab axis carries the softmax state
            vmem_limit_bytes=_vmem_limit_bytes(Bp, Hp, TO),
        ),
    )(
        tokens,
        params["embedding"],
        h_prev,
        params["w_ih_t"],
        params["w_hh_t"],
        params["b_ih"],
        params["b_hh"],
        params["w_out_t"],
        params["b_out"],
    )

    # log-softmax finalize (cheap elementwise; keeps the kernel's pred writeback streamed).
    prediction = logits_pad[:B, :O] - lse_pad[:B]
    h_new = h_new_pad[:B, :H]
    return prediction, h_new[None, :, :]


def init_params(key, output_dim, hidden_dim):
    """PyTorch-layout params, pre-transposed, padded lane/sublane-dense, bf16 weights."""
    Hp = _round_up(hidden_dim, 128)
    Op = _round_up(output_dim, 128)
    ks = jax.random.split(key, 7)
    scale = 0.1

    emb = scale * jax.random.normal(ks[0], (output_dim, hidden_dim), jnp.float32)
    w_ih = scale * jax.random.normal(ks[1], (hidden_dim, 3 * hidden_dim), jnp.float32)
    w_hh = scale * jax.random.normal(ks[2], (hidden_dim, 3 * hidden_dim), jnp.float32)
    b_ih = scale * jax.random.normal(ks[3], (3 * hidden_dim,), jnp.float32)
    b_hh = scale * jax.random.normal(ks[4], (3 * hidden_dim,), jnp.float32)
    w_out = scale * jax.random.normal(ks[5], (hidden_dim, output_dim), jnp.float32)
    b_out = scale * jax.random.normal(ks[6], (output_dim,), jnp.float32)

    def pad_gate_w(w):   # (H, 3H) -> (Hp, 3Hp): pad each gate block independently
        parts = jnp.split(w, 3, axis=1)
        parts = [jnp.pad(p, ((0, Hp - hidden_dim), (0, Hp - hidden_dim))) for p in parts]
        return jnp.concatenate(parts, axis=1)

    def pad_gate_b(b):   # (3H,) -> (1, 3Hp)
        parts = jnp.split(b, 3)
        parts = [jnp.pad(p, (0, Hp - hidden_dim)) for p in parts]
        return jnp.concatenate(parts)[None, :]

    return {
        # embedding rows stay = vocab size (per-row DMA gather source); columns padded to Hp.
        "embedding": jnp.pad(emb, ((0, 0), (0, Hp - hidden_dim))),
        # PyTorch weight_ih_l0 is (3H, H); stored transposed (Hp, 3Hp) in bf16.
        "w_ih_t": pad_gate_w(w_ih).astype(jnp.bfloat16),
        "w_hh_t": pad_gate_w(w_hh).astype(jnp.bfloat16),
        "b_ih": pad_gate_b(b_ih),
        "b_hh": pad_gate_b(b_hh),
        # nn.Linear weight is (O, H); stored transposed (Hp, Op) in bf16.
        "w_out_t": jnp.pad(w_out, ((0, Hp - hidden_dim), (0, Op - output_dim))).astype(jnp.bfloat16),
        # padded vocab columns get a huge negative bias so they vanish from the softmax.
        "b_out": jnp.pad(b_out, (0, Op - output_dim), constant_values=-1e9)[None, :],
    }


def _reference_forward(params, input_token, hidden):
    """Pure-JAX reference (same padded params, f32 math) for correctness checking."""
    H = hidden.shape[2]
    O = params["embedding"].shape[0]
    x = params["embedding"][input_token[:, 0]].astype(jnp.float32)          # (B, Hp)
    Hp = x.shape[1]
    h = jnp.pad(hidden[0].astype(jnp.float32), ((0, 0), (0, Hp - H)))       # (B, Hp)
    gi = x @ params["w_ih_t"].astype(jnp.float32) + params["b_ih"]
    gh = h @ params["w_hh_t"].astype(jnp.float32) + params["b_hh"]
    i_r, i_z, i_n = gi[:, :Hp], gi[:, Hp:2 * Hp], gi[:, 2 * Hp:]
    h_r, h_z, h_n = gh[:, :Hp], gh[:, Hp:2 * Hp], gh[:, 2 * Hp:]
    r = jax.nn.sigmoid(i_r + h_r)
    z = jax.nn.sigmoid(i_z + h_z)
    n = jnp.tanh(i_n + r * h_n)
    h_new = (1.0 - z) * n + z * h
    logits = h_new @ params["w_out_t"].astype(jnp.float32) + params["b_out"]
    pred = jax.nn.log_softmax(logits, axis=-1)[:, :O]
    return pred, h_new[:, :H][None, :, :]


if __name__ == "__main__":
    batch = 2
    hidden_dim = 32
    output_dim = 3000   # pads to 3072 -> two 1536-wide vocab tiles: exercises the online softmax

    key = jax.random.PRNGKey(0)
    k_par, k_tok, k_hid = jax.random.split(key, 3)

    params = init_params(k_par, output_dim, hidden_dim)
    input_token = jax.random.randint(k_tok, (batch, 1), 0, output_dim, dtype=jnp.int32)
    hidden = jax.random.normal(k_hid, (1, batch, hidden_dim), jnp.float32)

    fwd = jax.jit(decoder_rnn_forward)
    prediction, new_hidden = fwd(params, input_token, hidden)
    jax.block_until_ready((prediction, new_hidden))

    assert prediction.shape == (batch, output_dim)
    assert new_hidden.shape == (1, batch, hidden_dim)
    # log-softmax rows should (exp-)sum to ~1
    assert jnp.allclose(jnp.sum(jnp.exp(prediction), axis=1), 1.0, atol=1e-4)

    # Cross-check against a pure-JAX reference (bf16 weight storage, f32 reference math).
    ref_pred, ref_hidden = _reference_forward(params, input_token, hidden)
    assert jnp.allclose(prediction, ref_pred, atol=5e-2), float(jnp.max(jnp.abs(prediction - ref_pred)))
    assert jnp.allclose(new_hidden, ref_hidden, atol=2e-2), float(jnp.max(jnp.abs(new_hidden - ref_hidden)))

    print("KERNEL_OK")
</pallas_src>

<mosaic_0001>
module attributes {stable_mosaic.version = 11 : i64} {
  func.func @_decoder_kernel(%arg0: i32, %arg1: memref<8xi32, #tpu.memory_space<smem>>, %arg2: memref<3000x128xf32, #tpu.memory_space<any>>, %arg3: memref<8x128xf32, #tpu.memory_space<vmem>>, %arg4: memref<128x384xbf16, #tpu.memory_space<vmem>>, %arg5: memref<128x384xbf16, #tpu.memory_space<vmem>>, %arg6: memref<1x384xf32, #tpu.memory_space<vmem>>, %arg7: memref<1x384xf32, #tpu.memory_space<vmem>>, %arg8: memref<128x1536xbf16, #tpu.memory_space<vmem>>, %arg9: memref<1x1536xf32, #tpu.memory_space<vmem>>, %arg10: memref<8x1536xf32, #tpu.memory_space<vmem>>, %arg11: memref<8x1xf32, #tpu.memory_space<vmem>>, %arg12: memref<8x128xf32, #tpu.memory_space<vmem>>, %arg13: memref<8x128xf32, #tpu.memory_space<vmem>>, %arg14: memref<8x128xbf16, #tpu.memory_space<vmem>>, %arg15: memref<8x1xf32, #tpu.memory_space<vmem>>, %arg16: memref<8x1xf32, #tpu.memory_space<vmem>>, %arg17: memref<8x!tpu.dma_semaphore, #tpu.memory_space<semaphore_mem>>) attributes {dimension_semantics = [#tpu.dimension_semantics<arbitrary>], iteration_bounds = array<i64: 2>, scalar_prefetch = 1 : i64, scratch_operands = 5 : i64, tpu.core_type = #tpu.core_type<tc>, window_params = [{}, {pipeline_mode = #tpu.pipeline_mode<synchronous>, transform_indices = @transform_1, window_bounds = array<i64: 8, 128>}, {pipeline_mode = #tpu.pipeline_mode<synchronous>, transform_indices = @transform_2, window_bounds = array<i64: 128, 384>}, {pipeline_mode = #tpu.pipeline_mode<synchronous>, transform_indices = @transform_3, window_bounds = array<i64: 128, 384>}, {pipeline_mode = #tpu.pipeline_mode<synchronous>, transform_indices = @transform_4, window_bounds = array<i64: 1, 384>}, {pipeline_mode = #tpu.pipeline_mode<synchronous>, transform_indices = @transform_5, window_bounds = array<i64: 1, 384>}, {transform_indices = @transform_6, window_bounds = array<i64: 128, 1536>}, {transform_indices = @transform_7, window_bounds = array<i64: 1, 1536>}, {transform_indices = @transform_8, window_bounds = array<i64: 8, 1536>}, {pipeline_mode = #tpu.pipeline_mode<synchronous>, transform_indices = @transform_9, window_bounds = array<i64: 8, 1>}, {pipeline_mode = #tpu.pipeline_mode<synchronous>, transform_indices = @transform_10, window_bounds = array<i64: 8, 128>}]} {
    %c0_i32 = arith.constant 0 : i32
    %0 = arith.cmpi eq, %arg0, %c0_i32 : i32
    %1 = arith.extui %0 : i1 to i32
    %c0_i32_0 = arith.constant 0 : i32
    %2 = arith.cmpi ne, %1, %c0_i32_0 : i32
    scf.if %2 {
      %c0_21 = arith.constant 0 : index
      %30 = memref.load %arg1[%c0_21] : memref<8xi32, #tpu.memory_space<smem>>
      %c1 = arith.constant 1 : index
      %31 = memref.load %arg1[%c1] : memref<8xi32, #tpu.memory_space<smem>>
      %c2 = arith.constant 2 : index
      %32 = memref.load %arg1[%c2] : memref<8xi32, #tpu.memory_space<smem>>
      %c3 = arith.constant 3 : index
      %33 = memref.load %arg1[%c3] : memref<8xi32, #tpu.memory_space<smem>>
      %c4 = arith.constant 4 : index
      %34 = memref.load %arg1[%c4] : memref<8xi32, #tpu.memory_space<smem>>
      %c5 = arith.constant 5 : index
      %35 = memref.load %arg1[%c5] : memref<8xi32, #tpu.memory_space<smem>>
      %c6 = arith.constant 6 : index
      %36 = memref.load %arg1[%c6] : memref<8xi32, #tpu.memory_space<smem>>
      %c7 = arith.constant 7 : index
      %37 = memref.load %arg1[%c7] : memref<8xi32, #tpu.memory_space<smem>>
      %c0_i32_22 = arith.constant 0 : i32
      %c0_i32_23 = arith.constant 0 : i32
      %38 = tpu.memref_slice %arg2[%30, %c0_i32_23] : memref<3000x128xf32, #tpu.memory_space<any>> -> memref<1x128xf32, #tpu.memory_space<any>>
      %c0_i32_24 = arith.constant 0 : i32
      %c0_i32_25 = arith.constant 0 : i32
      %39 = tpu.memref_slice %arg13[%c0_i32_24, %c0_i32_25] : memref<8x128xf32, #tpu.memory_space<vmem>> -> memref<1x128xf32, #tpu.memory_space<vmem>>
      %40 = tpu.memref_slice %arg17[%c0_i32_22] : memref<8x!tpu.dma_semaphore, #tpu.memory_space<semaphore_mem>> -> memref<1x!tpu.dma_semaphore, #tpu.memory_space<semaphore_mem>>
      %41 = tpu.memref_squeeze %40 : memref<1x!tpu.dma_semaphore, #tpu.memory_space<semaphore_mem>> -> memref<!tpu.dma_semaphore, #tpu.memory_space<semaphore_mem>>
      tpu.enqueue_dma source(%38 : memref<1x128xf32, #tpu.memory_space<any>>) target(%39 : memref<1x128xf32, #tpu.memory_space<vmem>>) target_semaphore(%41 : memref<!tpu.dma_semaphore, #tpu.memory_space<semaphore_mem>>)
      %c1_i32_26 = arith.constant 1 : i32
      %c0_i32_27 = arith.constant 0 : i32
      %42 = tpu.memref_slice %arg2[%31, %c0_i32_27] : memref<3000x128xf32, #tpu.memory_space<any>> -> memref<1x128xf32, #tpu.memory_space<any>>
      %c1_i32_28 = arith.constant 1 : i32
      %c0_i32_29 = arith.constant 0 : i32
      %43 = tpu.memref_slice %arg13[%c1_i32_28, %c0_i32_29] : memref<8x128xf32, #tpu.memory_space<vmem>> -> memref<1x128xf32, #tpu.memory_space<vmem>>
      %44 = tpu.memref_slice %arg17[%c1_i32_26] : memref<8x!tpu.dma_semaphore, #tpu.memory_space<semaphore_mem>> -> memref<1x!tpu.dma_semaphore, #tpu.memory_space<semaphore_mem>>
      %45 = tpu.memref_squeeze %44 : memref<1x!tpu.dma_semaphore, #tpu.memory_space<semaphore_mem>> -> memref<!tpu.dma_semaphore, #tpu.memory_space<semaphore_mem>>
      tpu.enqueue_dma source(%42 : memref<1x128xf32, #tpu.memory_space<any>>) target(%43 : memref<1x128xf32, #tpu.memory_space<vmem>>) target_semaphore(%45 : memref<!tpu.dma_semaphore, #tpu.memory_space<semaphore_mem>>)
      %c2_i32 = arith.constant 2 : i32
      %c0_i32_30 = arith.constant 0 : i32
      %46 = tpu.memref_slice %arg2[%32, %c0_i32_30] : memref<3000x128xf32, #tpu.memory_space<any>> -> memref<1x128xf32, #tpu.memory_space<any>>
      %c2_i32_31 = arith.constant 2 : i32
      %c0_i32_32 = arith.constant 0 : i32
      %47 = tpu.memref_slice %arg13[%c2_i32_31, %c0_i32_32] : memref<8x128xf32, #tpu.memory_space<vmem>> -> memref<1x128xf32, #tpu.memory_space<vmem>>
      %48 = tpu.memref_slice %arg17[%c2_i32] : memref<8x!tpu.dma_semaphore, #tpu.memory_space<semaphore_mem>> -> memref<1x!tpu.dma_semaphore, #tpu.memory_space<semaphore_mem>>
      %49 = tpu.memref_squeeze %48 : memref<1x!tpu.dma_semaphore, #tpu.memory_space<semaphore_mem>> -> memref<!tpu.dma_semaphore, #tpu.memory_space<semaphore_mem>>
      tpu.enqueue_dma source(%46 : memref<1x128xf32, #tpu.memory_space<any>>) target(%47 : memref<1x128xf32, #tpu.memory_space<vmem>>) target_semaphore(%49 : memref<!tpu.dma_semaphore, #tpu.memory_space<semaphore_mem>>)
      %c3_i32 = arith.constant 3 : i32
      %c0_i32_33 = arith.constant 0 : i32
      %50 = tpu.memref_slice %arg2[%33, %c0_i32_33] : memref<3000x128xf32, #tpu.memory_space<any>> -> memref<1x128xf32, #tpu.memory_space<any>>
      %c3_i32_34 = arith.constant 3 : i32
      %c0_i32_35 = arith.constant 0 : i32
      %51 = tpu.memref_slice %arg13[%c3_i32_34, %c0_i32_35] : memref<8x128xf32, #tpu.memory_space<vmem>> -> memref<1x128xf32, #tpu.memory_space<vmem>>
      %52 = tpu.memref_slice %arg17[%c3_i32] : memref<8x!tpu.dma_semaphore, #tpu.memory_space<semaphore_mem>> -> memref<1x!tpu.dma_semaphore, #tpu.memory_space<semaphore_mem>>
      %53 = tpu.memref_squeeze %52 : memref<1x!tpu.dma_semaphore, #tpu.memory_space<semaphore_mem>> -> memref<!tpu.dma_semaphore, #tpu.memory_space<semaphore_mem>>
      tpu.enqueue_dma source(%50 : memref<1x128xf32, #tpu.memory_space<any>>) target(%51 : memref<1x128xf32, #tpu.memory_space<vmem>>) target_semaphore(%53 : memref<!tpu.dma_semaphore, #tpu.memory_space<semaphore_mem>>)
      %c4_i32 = arith.constant 4 : i32
      %c0_i32_36 = arith.constant 0 : i32
      %54 = tpu.memref_slice %arg2[%34, %c0_i32_36] : memref<3000x128xf32, #tpu.memory_space<any>> -> memref<1x128xf32, #tpu.memory_space<any>>
      %c4_i32_37 = arith.constant 4 : i32
      %c0_i32_38 = arith.constant 0 : i32
      %55 = tpu.memref_slice %arg13[%c4_i32_37, %c0_i32_38] : memref<8x128xf32, #tpu.memory_space<vmem>> -> memref<1x128xf32, #tpu.memory_space<vmem>>
      %56 = tpu.memref_slice %arg17[%c4_i32] : memref<8x!tpu.dma_semaphore, #tpu.memory_space<semaphore_mem>> -> memref<1x!tpu.dma_semaphore, #tpu.memory_space<semaphore_mem>>
      %57 = tpu.memref_squeeze %56 : memref<1x!tpu.dma_semaphore, #tpu.memory_space<semaphore_mem>> -> memref<!tpu.dma_semaphore, #tpu.memory_space<semaphore_mem>>
      tpu.enqueue_dma source(%54 : memref<1x128xf32, #tpu.memory_space<any>>) target(%55 : memref<1x128xf32, #tpu.memory_space<vmem>>) target_semaphore(%57 : memref<!tpu.dma_semaphore, #tpu.memory_space<semaphore_mem>>)
      %c5_i32 = arith.constant 5 : i32
      %c0_i32_39 = arith.constant 0 : i32
      %58 = tpu.memref_slice %arg2[%35, %c0_i32_39] : memref<3000x128xf32, #tpu.memory_space<any>> -> memref<1x128xf32, #tpu.memory_space<any>>
      %c5_i32_40 = arith.constant 5 : i32
      %c0_i32_41 = arith.constant 0 : i32
      %59 = tpu.memref_slice %arg13[%c5_i32_40, %c0_i32_41] : memref<8x128xf32, #tpu.memory_space<vmem>> -> memref<1x128xf32, #tpu.memory_space<vmem>>
      %60 = tpu.memref_slice %arg17[%c5_i32] : memref<8x!tpu.dma_semaphore, #tpu.memory_space<semaphore_mem>> -> memref<1x!tpu.dma_semaphore, #tpu.memory_space<semaphore_mem>>
      %61 = tpu.memref_squeeze %60 : memref<1x!tpu.dma_semaphore, #tpu.memory_space<semaphore_mem>> -> memref<!tpu.dma_semaphore, #tpu.memory_space<semaphore_mem>>
      tpu.enqueue_dma source(%58 : memref<1x128xf32, #tpu.memory_space<any>>) target(%59 : memref<1x128xf32, #tpu.memory_space<vmem>>) target_semaphore(%61 : memref<!tpu.dma_semaphore, #tpu.memory_space<semaphore_mem>>)
      %c6_i32 = arith.constant 6 : i32
      %c0_i32_42 = arith.constant 0 : i32
      %62 = tpu.memref_slice %arg2[%36, %c0_i32_42] : memref<3000x128xf32, #tpu.memory_space<any>> -> memref<1x128xf32, #tpu.memory_space<any>>
      %c6_i32_43 = arith.constant 6 : i32
      %c0_i32_44 = arith.constant 0 : i32
      %63 = tpu.memref_slice %arg13[%c6_i32_43, %c0_i32_44] : memref<8x128xf32, #tpu.memory_space<vmem>> -> memref<1x128xf32, #tpu.memory_space<vmem>>
      %64 = tpu.memref_slice %arg17[%c6_i32] : memref<8x!tpu.dma_semaphore, #tpu.memory_space<semaphore_mem>> -> memref<1x!tpu.dma_semaphore, #tpu.memory_space<semaphore_mem>>
      %65 = tpu.memref_squeeze %64 : memref<1x!tpu.dma_semaphore, #tpu.memory_space<semaphore_mem>> -> memref<!tpu.dma_semaphore, #tpu.memory_space<semaphore_mem>>
      tpu.enqueue_dma source(%62 : memref<1x128xf32, #tpu.memory_space<any>>) target(%63 : memref<1x128xf32, #tpu.memory_space<vmem>>) target_semaphore(%65 : memref<!tpu.dma_semaphore, #tpu.memory_space<semaphore_mem>>)
      %c7_i32 = arith.constant 7 : i32
      %c0_i32_45 = arith.constant 0 : i32
      %66 = tpu.memref_slice %arg2[%37, %c0_i32_45] : memref<3000x128xf32, #tpu.memory_space<any>> -> memref<1x128xf32, #tpu.memory_space<any>>
      %c7_i32_46 = arith.constant 7 : i32
      %c0_i32_47 = arith.constant 0 : i32
      %67 = tpu.memref_slice %arg13[%c7_i32_46, %c0_i32_47] : memref<8x128xf32, #tpu.memory_space<vmem>> -> memref<1x128xf32, #tpu.memory_space<vmem>>
      %68 = tpu.memref_slice %arg17[%c7_i32] : memref<8x!tpu.dma_semaphore, #tpu.memory_space<semaphore_mem>> -> memref<1x!tpu.dma_semaphore, #tpu.memory_space<semaphore_mem>>
      %69 = tpu.memref_squeeze %68 : memref<1x!tpu.dma_semaphore, #tpu.memory_space<semaphore_mem>> -> memref<!tpu.dma_semaphore, #tpu.memory_space<semaphore_mem>>
      tpu.enqueue_dma source(%66 : memref<1x128xf32, #tpu.memory_space<any>>) target(%67 : memref<1x128xf32, #tpu.memory_space<vmem>>) target_semaphore(%69 : memref<!tpu.dma_semaphore, #tpu.memory_space<semaphore_mem>>)
      %c0_48 = arith.constant 0 : index
      %c0_49 = arith.constant 0 : index
      %70 = vector.load %arg3[%c0_48, %c0_49] : memref<8x128xf32, #tpu.memory_space<vmem>>, vector<8x128xf32>
      %71 = arith.truncf %70 : vector<8x128xf32> to vector<8x128xbf16>
      %c0_50 = arith.constant 0 : index
      %c0_51 = arith.constant 0 : index
      %72 = vector.load %arg5[%c0_50, %c0_51] : memref<128x384xbf16, #tpu.memory_space<vmem>>, vector<128x384xbf16>
      %cst_52 = arith.constant dense<0.000000e+00> : vector<8x384xf32>
      %73 = tpu.matmul %71, %72, %cst_52 {dimension_numbers = #tpu.dot_dimension_numbers<[1], [0], [0], [1], [0, 0, 1, 1], [], []>} : vector<8x128xbf16>, vector<128x384xbf16>, vector<8x384xf32> -> vector<8x384xf32>
      %c0_53 = arith.constant 0 : index
      %c0_54 = arith.constant 0 : index
      %74 = vector.load %arg7[%c0_53, %c0_54] : memref<1x384xf32, #tpu.memory_space<vmem>>, vector<1x384xf32>
      %75 = vector.broadcast %74 : vector<1x384xf32> to vector<8x384xf32>
      %76 = arith.addf %73, %75 : vector<8x384xf32>
      %c0_i32_55 = arith.constant 0 : i32
      %c0_i32_56 = arith.constant 0 : i32
      %77 = tpu.memref_slice %arg2[%30, %c0_i32_56] : memref<3000x128xf32, #tpu.memory_space<any>> -> memref<1x128xf32, #tpu.memory_space<any>>
      %c0_i32_57 = arith.constant 0 : i32
      %c0_i32_58 = arith.constant 0 : i32
      %78 = tpu.memref_slice %arg13[%c0_i32_57, %c0_i32_58] : memref<8x128xf32, #tpu.memory_space<vmem>> -> memref<1x128xf32, #tpu.memory_space<vmem>>
      %79 = tpu.memref_slice %arg17[%c0_i32_55] : memref<8x!tpu.dma_semaphore, #tpu.memory_space<semaphore_mem>> -> memref<1x!tpu.dma_semaphore, #tpu.memory_space<semaphore_mem>>
      %80 = tpu.memref_squeeze %79 : memref<1x!tpu.dma_semaphore, #tpu.memory_space<semaphore_mem>> -> memref<!tpu.dma_semaphore, #tpu.memory_space<semaphore_mem>>
      tpu.wait_dma2 semaphore(%80 : memref<!tpu.dma_semaphore, #tpu.memory_space<semaphore_mem>>) src(%77 : memref<1x128xf32, #tpu.memory_space<any>>) dst(%78 : memref<1x128xf32, #tpu.memory_space<vmem>>)
      %c1_i32_59 = arith.constant 1 : i32
      %c0_i32_60 = arith.constant 0 : i32
      %81 = tpu.memref_slice %arg2[%31, %c0_i32_60] : memref<3000x128xf32, #tpu.memory_space<any>> -> memref<1x128xf32, #tpu.memory_space<any>>
      %c1_i32_61 = arith.constant 1 : i32
      %c0_i32_62 = arith.constant 0 : i32
      %82 = tpu.memref_slice %arg13[%c1_i32_61, %c0_i32_62] : memref<8x128xf32, #tpu.memory_space<vmem>> -> memref<1x128xf32, #tpu.memory_space<vmem>>
      %83 = tpu.memref_slice %arg17[%c1_i32_59] : memref<8x!tpu.dma_semaphore, #tpu.memory_space<semaphore_mem>> -> memref<1x!tpu.dma_semaphore, #tpu.memory_space<semaphore_mem>>
      %84 = tpu.memref_squeeze %83 : memref<1x!tpu.dma_semaphore, #tpu.memory_space<semaphore_mem>> -> memref<!tpu.dma_semaphore, #tpu.memory_space<semaphore_mem>>
      tpu.wait_dma2 semaphore(%84 : memref<!tpu.dma_semaphore, #tpu.memory_space<semaphore_mem>>) src(%81 : memref<1x128xf32, #tpu.memory_space<any>>) dst(%82 : memref<1x128xf32, #tpu.memory_space<vmem>>)
      %c2_i32_63 = arith.constant 2 : i32
      %c0_i32_64 = arith.constant 0 : i32
      %85 = tpu.memref_slice %arg2[%32, %c0_i32_64] : memref<3000x128xf32, #tpu.memory_space<any>> -> memref<1x128xf32, #tpu.memory_space<any>>
      %c2_i32_65 = arith.constant 2 : i32
      %c0_i32_66 = arith.constant 0 : i32
      %86 = tpu.memref_slice %arg13[%c2_i32_65, %c0_i32_66] : memref<8x128xf32, #tpu.memory_space<vmem>> -> memref<1x128xf32, #tpu.memory_space<vmem>>
      %87 = tpu.memref_slice %arg17[%c2_i32_63] : memref<8x!tpu.dma_semaphore, #tpu.memory_space<semaphore_mem>> -> memref<1x!tpu.dma_semaphore, #tpu.memory_space<semaphore_mem>>
      %88 = tpu.memref_squeeze %87 : memref<1x!tpu.dma_semaphore, #tpu.memory_space<semaphore_mem>> -> memref<!tpu.dma_semaphore, #tpu.memory_space<semaphore_mem>>
      tpu.wait_dma2 semaphore(%88 : memref<!tpu.dma_semaphore, #tpu.memory_space<semaphore_mem>>) src(%85 : memref<1x128xf32, #tpu.memory_space<any>>) dst(%86 : memref<1x128xf32, #tpu.memory_space<vmem>>)
      %c3_i32_67 = arith.constant 3 : i32
      %c0_i32_68 = arith.constant 0 : i32
      %89 = tpu.memref_slice %arg2[%33, %c0_i32_68] : memref<3000x128xf32, #tpu.memory_space<any>> -> memref<1x128xf32, #tpu.memory_space<any>>
      %c3_i32_69 = arith.constant 3 : i32
      %c0_i32_70 = arith.constant 0 : i32
      %90 = tpu.memref_slice %arg13[%c3_i32_69, %c0_i32_70] : memref<8x128xf32, #tpu.memory_space<vmem>> -> memref<1x128xf32, #tpu.memory_space<vmem>>
      %91 = tpu.memref_slice %arg17[%c3_i32_67] : memref<8x!tpu.dma_semaphore, #tpu.memory_space<semaphore_mem>> -> memref<1x!tpu.dma_semaphore, #tpu.memory_space<semaphore_mem>>
      %92 = tpu.memref_squeeze %91 : memref<1x!tpu.dma_semaphore, #tpu.memory_space<semaphore_mem>> -> memref<!tpu.dma_semaphore, #tpu.memory_space<semaphore_mem>>
      tpu.wait_dma2 semaphore(%92 : memref<!tpu.dma_semaphore, #tpu.memory_space<semaphore_mem>>) src(%89 : memref<1x128xf32, #tpu.memory_space<any>>) dst(%90 : memref<1x128xf32, #tpu.memory_space<vmem>>)
      %c4_i32_71 = arith.constant 4 : i32
      %c0_i32_72 = arith.constant 0 : i32
      %93 = tpu.memref_slice %arg2[%34, %c0_i32_72] : memref<3000x128xf32, #tpu.memory_space<any>> -> memref<1x128xf32, #tpu.memory_space<any>>
      %c4_i32_73 = arith.constant 4 : i32
      %c0_i32_74 = arith.constant 0 : i32
      %94 = tpu.memref_slice %arg13[%c4_i32_73, %c0_i32_74] : memref<8x128xf32, #tpu.memory_space<vmem>> -> memref<1x128xf32, #tpu.memory_space<vmem>>
      %95 = tpu.memref_slice %arg17[%c4_i32_71] : memref<8x!tpu.dma_semaphore, #tpu.memory_space<semaphore_mem>> -> memref<1x!tpu.dma_semaphore, #tpu.memory_space<semaphore_mem>>
      %96 = tpu.memref_squeeze %95 : memref<1x!tpu.dma_semaphore, #tpu.memory_space<semaphore_mem>> -> memref<!tpu.dma_semaphore, #tpu.memory_space<semaphore_mem>>
      tpu.wait_dma2 semaphore(%96 : memref<!tpu.dma_semaphore, #tpu.memory_space<semaphore_mem>>) src(%93 : memref<1x128xf32, #tpu.memory_space<any>>) dst(%94 : memref<1x128xf32, #tpu.memory_space<vmem>>)
      %c5_i32_75 = arith.constant 5 : i32
      %c0_i32_76 = arith.constant 0 : i32
      %97 = tpu.memref_slice %arg2[%35, %c0_i32_76] : memref<3000x128xf32, #tpu.memory_space<any>> -> memref<1x128xf32, #tpu.memory_space<any>>
      %c5_i32_77 = arith.constant 5 : i32
      %c0_i32_78 = arith.constant 0 : i32
      %98 = tpu.memref_slice %arg13[%c5_i32_77, %c0_i32_78] : memref<8x128xf32, #tpu.memory_space<vmem>> -> memref<1x128xf32, #tpu.memory_space<vmem>>
      %99 = tpu.memref_slice %arg17[%c5_i32_75] : memref<8x!tpu.dma_semaphore, #tpu.memory_space<semaphore_mem>> -> memref<1x!tpu.dma_semaphore, #tpu.memory_space<semaphore_mem>>
      %100 = tpu.memref_squeeze %99 : memref<1x!tpu.dma_semaphore, #tpu.memory_space<semaphore_mem>> -> memref<!tpu.dma_semaphore, #tpu.memory_space<semaphore_mem>>
      tpu.wait_dma2 semaphore(%100 : memref<!tpu.dma_semaphore, #tpu.memory_space<semaphore_mem>>) src(%97 : memref<1x128xf32, #tpu.memory_space<any>>) dst(%98 : memref<1x128xf32, #tpu.memory_space<vmem>>)
      %c6_i32_79 = arith.constant 6 : i32
      %c0_i32_80 = arith.constant 0 : i32
      %101 = tpu.memref_slice %arg2[%36, %c0_i32_80] : memref<3000x128xf32, #tpu.memory_space<any>> -> memref<1x128xf32, #tpu.memory_space<any>>
      %c6_i32_81 = arith.constant 6 : i32
      %c0_i32_82 = arith.constant 0 : i32
      %102 = tpu.memref_slice %arg13[%c6_i32_81, %c0_i32_82] : memref<8x128xf32, #tpu.memory_space<vmem>> -> memref<1x128xf32, #tpu.memory_space<vmem>>
      %103 = tpu.memref_slice %arg17[%c6_i32_79] : memref<8x!tpu.dma_semaphore, #tpu.memory_space<semaphore_mem>> -> memref<1x!tpu.dma_semaphore, #tpu.memory_space<semaphore_mem>>
      %104 = tpu.memref_squeeze %103 : memref<1x!tpu.dma_semaphore, #tpu.memory_space<semaphore_mem>> -> memref<!tpu.dma_semaphore, #tpu.memory_space<semaphore_mem>>
      tpu.wait_dma2 semaphore(%104 : memref<!tpu.dma_semaphore, #tpu.memory_space<semaphore_mem>>) src(%101 : memref<1x128xf32, #tpu.memory_space<any>>) dst(%102 : memref<1x128xf32, #tpu.memory_space<vmem>>)
      %c7_i32_83 = arith.constant 7 : i32
      %c0_i32_84 = arith.constant 0 : i32
      %105 = tpu.memref_slice %arg2[%37, %c0_i32_84] : memref<3000x128xf32, #tpu.memory_space<any>> -> memref<1x128xf32, #tpu.memory_space<any>>
      %c7_i32_85 = arith.constant 7 : i32
      %c0_i32_86 = arith.constant 0 : i32
      %106 = tpu.memref_slice %arg13[%c7_i32_85, %c0_i32_86] : memref<8x128xf32, #tpu.memory_space<vmem>> -> memref<1x128xf32, #tpu.memory_space<vmem>>
      %107 = tpu.memref_slice %arg17[%c7_i32_83] : memref<8x!tpu.dma_semaphore, #tpu.memory_space<semaphore_mem>> -> memref<1x!tpu.dma_semaphore, #tpu.memory_space<semaphore_mem>>
      %108 = tpu.memref_squeeze %107 : memref<1x!tpu.dma_semaphore, #tpu.memory_space<semaphore_mem>> -> memref<!tpu.dma_semaphore, #tpu.memory_space<semaphore_mem>>
      tpu.wait_dma2 semaphore(%108 : memref<!tpu.dma_semaphore, #tpu.memory_space<semaphore_mem>>) src(%105 : memref<1x128xf32, #tpu.memory_space<any>>) dst(%106 : memref<1x128xf32, #tpu.memory_space<vmem>>)
      %c0_87 = arith.constant 0 : index
      %c0_88 = arith.constant 0 : index
      %109 = vector.load %arg13[%c0_87, %c0_88] : memref<8x128xf32, #tpu.memory_space<vmem>>, vector<8x128xf32>
      %110 = arith.truncf %109 : vector<8x128xf32> to vector<8x128xbf16>
      %c0_89 = arith.constant 0 : index
      %c0_90 = arith.constant 0 : index
      %111 = vector.load %arg4[%c0_89, %c0_90] : memref<128x384xbf16, #tpu.memory_space<vmem>>, vector<128x384xbf16>
      %cst_91 = arith.constant dense<0.000000e+00> : vector<8x384xf32>
      %112 = tpu.matmul %110, %111, %cst_91 {dimension_numbers = #tpu.dot_dimension_numbers<[1], [0], [0], [1], [0, 0, 1, 1], [], []>} : vector<8x128xbf16>, vector<128x384xbf16>, vector<8x384xf32> -> vector<8x384xf32>
      %c0_92 = arith.constant 0 : index
      %c0_93 = arith.constant 0 : index
      %113 = vector.load %arg6[%c0_92, %c0_93] : memref<1x384xf32, #tpu.memory_space<vmem>>, vector<1x384xf32>
      %114 = vector.broadcast %113 : vector<1x384xf32> to vector<8x384xf32>
      %115 = arith.addf %112, %114 : vector<8x384xf32>
      %116 = vector.extract_strided_slice %115 {offsets = [0, 0], sizes = [8, 128], strides = [1, 1]} : vector<8x384xf32> to vector<8x128xf32>
      %117 = vector.extract_strided_slice %115 {offsets = [0, 128], sizes = [8, 128], strides = [1, 1]} : vector<8x384xf32> to vector<8x128xf32>
      %118 = vector.extract_strided_slice %115 {offsets = [0, 256], sizes = [8, 128], strides = [1, 1]} : vector<8x384xf32> to vector<8x128xf32>
      %119 = vector.extract_strided_slice %76 {offsets = [0, 0], sizes = [8, 128], strides = [1, 1]} : vector<8x384xf32> to vector<8x128xf32>
      %120 = vector.extract_strided_slice %76 {offsets = [0, 128], sizes = [8, 128], strides = [1, 1]} : vector<8x384xf32> to vector<8x128xf32>
      %121 = vector.extract_strided_slice %76 {offsets = [0, 256], sizes = [8, 128], strides = [1, 1]} : vector<8x384xf32> to vector<8x128xf32>
      %122 = arith.addf %116, %119 : vector<8x128xf32>
      %123 = arith.negf %122 : vector<8x128xf32>
      %124 = math.exp %123 : vector<8x128xf32>
      %cst_94 = arith.constant 1.000000e+00 : f32
      %125 = vector.broadcast %cst_94 : f32 to vector<8x128xf32>
      %126 = arith.addf %125, %124 : vector<8x128xf32>
      %127 = arith.divf %125, %126 : vector<8x128xf32>
      %128 = arith.addf %117, %120 : vector<8x128xf32>
      %129 = arith.negf %128 : vector<8x128xf32>
      %130 = math.exp %129 : vector<8x128xf32>
      %cst_95 = arith.constant 1.000000e+00 : f32
      %131 = vector.broadcast %cst_95 : f32 to vector<8x128xf32>
      %132 = arith.addf %131, %130 : vector<8x128xf32>
      %133 = arith.divf %131, %132 : vector<8x128xf32>
      %134 = arith.mulf %127, %121 : vector<8x128xf32>
      %135 = arith.addf %118, %134 : vector<8x128xf32>
      %136 = math.tanh %135 : vector<8x128xf32>
      %cst_96 = arith.constant 1.000000e+00 : f32
      %137 = vector.broadcast %cst_96 : f32 to vector<8x128xf32>
      %138 = arith.subf %137, %133 : vector<8x128xf32>
      %139 = arith.mulf %138, %136 : vector<8x128xf32>
      %140 = arith.mulf %133, %70 : vector<8x128xf32>
      %141 = arith.addf %139, %140 : vector<8x128xf32>
      %c0_97 = arith.constant 0 : index
      %c0_98 = arith.constant 0 : index
      %142 = vector.load %arg12[%c0_97, %c0_98] : memref<8x128xf32, #tpu.memory_space<vmem>>, vector<8x128xf32>
      tpu.vector_store %arg12[%c0_97, %c0_98], %141 {strides = array<i32>} : memref<8x128xf32, #tpu.memory_space<vmem>>, vector<8x128xf32>,
      %143 = arith.truncf %141 : vector<8x128xf32> to vector<8x128xbf16>
      %c0_99 = arith.constant 0 : index
      %c0_100 = arith.constant 0 : index
      %144 = vector.load %arg14[%c0_99, %c0_100] : memref<8x128xbf16, #tpu.memory_space<vmem>>, vector<8x128xbf16>
      tpu.vector_store %arg14[%c0_99, %c0_100], %143 {strides = array<i32>} : memref<8x128xbf16, #tpu.memory_space<vmem>>, vector<8x128xbf16>,
      %cst_101 = arith.constant -1.000000e+30 : f32
      %145 = vector.broadcast %cst_101 : f32 to vector<8x1xf32>
      %c0_102 = arith.constant 0 : index
      %c0_103 = arith.constant 0 : index
      %146 = vector.load %arg15[%c0_102, %c0_103] : memref<8x1xf32, #tpu.memory_space<vmem>>, vector<8x1xf32>
      tpu.vector_store %arg15[%c0_102, %c0_103], %145 {strides = array<i32>} : memref<8x1xf32, #tpu.memory_space<vmem>>, vector<8x1xf32>,
      %cst_104 = arith.constant 0.000000e+00 : f32
      %147 = vector.broadcast %cst_104 : f32 to vector<8x1xf32>
      %c0_105 = arith.constant 0 : index
      %c0_106 = arith.constant 0 : index
      %148 = vector.load %arg16[%c0_105, %c0_106] : memref<8x1xf32, #tpu.memory_space<vmem>>, vector<8x1xf32>
      tpu.vector_store %arg16[%c0_105, %c0_106], %147 {strides = array<i32>} : memref<8x1xf32, #tpu.memory_space<vmem>>, vector<8x1xf32>,
    } else {
    }
    %c0 = arith.constant 0 : index
    %c0_1 = arith.constant 0 : index
    %3 = vector.load %arg14[%c0, %c0_1] : memref<8x128xbf16, #tpu.memory_space<vmem>>, vector<8x128xbf16>
    %c0_2 = arith.constant 0 : index
    %c0_3 = arith.constant 0 : index
    %4 = vector.load %arg8[%c0_2, %c0_3] : memref<128x1536xbf16, #tpu.memory_space<vmem>>, vector<128x1536xbf16>
    %cst = arith.constant dense<0.000000e+00> : vector<8x1536xf32>
    %5 = tpu.matmul %3, %4, %cst {dimension_numbers = #tpu.dot_dimension_numbers<[1], [0], [0], [1], [0, 0, 1, 1], [], []>} : vector<8x128xbf16>, vector<128x1536xbf16>, vector<8x1536xf32> -> vector<8x1536xf32>
    %c0_4 = arith.constant 0 : index
    %c0_5 = arith.constant 0 : index
    %6 = vector.load %arg9[%c0_4, %c0_5] : memref<1x1536xf32, #tpu.memory_space<vmem>>, vector<1x1536xf32>
    %7 = vector.broadcast %6 : vector<1x1536xf32> to vector<8x1536xf32>
    %8 = arith.addf %5, %7 : vector<8x1536xf32>
    %c0_6 = arith.constant 0 : index
    %c0_7 = arith.constant 0 : index
    %9 = vector.load %arg10[%c0_6, %c0_7] : memref<8x1536xf32, #tpu.memory_space<vmem>>, vector<8x1536xf32>
    tpu.vector_store %arg10[%c0_6, %c0_7], %8 {strides = array<i32>} : memref<8x1536xf32, #tpu.memory_space<vmem>>, vector<8x1536xf32>,
    %cst_8 = arith.constant dense<0xFF800000> : vector<8xf32>
    %10 = vector.multi_reduction <maximumf>, %8, %cst_8 [1] : vector<8x1536xf32> to vector<8xf32>
    %11 = vector.shape_cast %10 : vector<8xf32> to vector<8x1xf32>
    %c0_9 = arith.constant 0 : index
    %c0_10 = arith.constant 0 : index
    %12 = vector.load %arg15[%c0_9, %c0_10] : memref<8x1xf32, #tpu.memory_space<vmem>>, vector<8x1xf32>
    %13 = arith.maximumf %12, %11 : vector<8x1xf32>
    %c0_11 = arith.constant 0 : index
    %c0_12 = arith.constant 0 : index
    %14 = vector.load %arg16[%c0_11, %c0_12] : memref<8x1xf32, #tpu.memory_space<vmem>>, vector<8x1xf32>
    %c0_13 = arith.constant 0 : index
    %c0_14 = arith.constant 0 : index
    %15 = vector.load %arg15[%c0_13, %c0_14] : memref<8x1xf32, #tpu.memory_space<vmem>>, vector<8x1xf32>
    %16 = arith.subf %15, %13 : vector<8x1xf32>
    %17 = math.exp %16 : vector<8x1xf32>
    %18 = arith.mulf %14, %17 : vector<8x1xf32>
    %19 = vector.broadcast %13 : vector<8x1xf32> to vector<8x1536xf32>
    %20 = arith.subf %8, %19 : vector<8x1536xf32>
    %21 = math.exp %20 : vector<8x1536xf32>
    %cst_15 = arith.constant dense<0.000000e+00> : vector<8xf32>
    %22 = vector.multi_reduction <add>, %21, %cst_15 [1] : vector<8x1536xf32> to vector<8xf32>
    %23 = vector.shape_cast %22 : vector<8xf32> to vector<8x1xf32>
    %24 = arith.addf %18, %23 : vector<8x1xf32>
    %c0_16 = arith.constant 0 : index
    %c0_17 = arith.constant 0 : index
    %25 = vector.load %arg16[%c0_16, %c0_17] : memref<8x1xf32, #tpu.memory_space<vmem>>, vector<8x1xf32>
    tpu.vector_store %arg16[%c0_16, %c0_17], %24 {strides = array<i32>} : memref<8x1xf32, #tpu.memory_space<vmem>>, vector<8x1xf32>,
    %c0_18 = arith.constant 0 : index
    %c0_19 = arith.constant 0 : index
    %26 = vector.load %arg15[%c0_18, %c0_19] : memref<8x1xf32, #tpu.memory_space<vmem>>, vector<8x1xf32>
    tpu.vector_store %arg15[%c0_18, %c0_19], %13 {strides = array<i32>} : memref<8x1xf32, #tpu.memory_space<vmem>>, vector<8x1xf32>,
    %c1_i32 = arith.constant 1 : i32
    %27 = arith.cmpi eq, %arg0, %c1_i32 : i32
    %28 = arith.extui %27 : i1 to i32
    %c0_i32_20 = arith.constant 0 : i32
    %29 = arith.cmpi ne, %28, %c0_i32_20 : i32
    scf.if %29 {
      %c0_21 = arith.constant 0 : index
      %c0_22 = arith.constant 0 : index
      %30 = vector.load %arg15[%c0_21, %c0_22] : memref<8x1xf32, #tpu.memory_space<vmem>>, vector<8x1xf32>
      %c0_23 = arith.constant 0 : index
      %c0_24 = arith.constant 0 : index
      %31 = vector.load %arg16[%c0_23, %c0_24] : memref<8x1xf32, #tpu.memory_space<vmem>>, vector<8x1xf32>
      %32 = math.log %31 : vector<8x1xf32>
      %33 = arith.addf %30, %32 : vector<8x1xf32>
      %c0_25 = arith.constant 0 : index
      %c0_26 = arith.constant 0 : index
      %34 = vector.load %arg11[%c0_25, %c0_26] : memref<8x1xf32, #tpu.memory_space<vmem>>, vector<8x1xf32>
      tpu.vector_store %arg11[%c0_25, %c0_26], %33 {strides = array<i32>} : memref<8x1xf32, #tpu.memory_space<vmem>>, vector<8x1xf32>,
    } else {
    }
    return
  }
  func.func @transform_1(%arg0: i32, %arg1: memref<8xi32, #tpu.memory_space<smem>>) -> (i32, i32) {
    %c0_i32 = arith.constant 0 : i32
    %c0_i32_0 = arith.constant 0 : i32
    %c0_i32_1 = arith.constant 0 : i32
    return %c0_i32, %c0_i32_0 : i32, i32
  }
  func.func @transform_2(%arg0: i32, %arg1: memref<8xi32, #tpu.memory_space<smem>>) -> (i32, i32) {
    %c0_i32 = arith.constant 0 : i32
    %c0_i32_0 = arith.constant 0 : i32
    %c0_i32_1 = arith.constant 0 : i32
    return %c0_i32, %c0_i32_0 : i32, i32
  }
  func.func @transform_3(%arg0: i32, %arg1: memref<8xi32, #tpu.memory_space<smem>>) -> (i32, i32) {
    %c0_i32 = arith.constant 0 : i32
    %c0_i32_0 = arith.constant 0 : i32
    %c0_i32_1 = arith.constant 0 : i32
    return %c0_i32, %c0_i32_0 : i32, i32
  }
  func.func @transform_4(%arg0: i32, %arg1: memref<8xi32, #tpu.memory_space<smem>>) -> (i32, i32) {
    %c0_i32 = arith.constant 0 : i32
    %c0_i32_0 = arith.constant 0 : i32
    %c0_i32_1 = arith.constant 0 : i32
    return %c0_i32, %c0_i32_0 : i32, i32
  }
  func.func @transform_5(%arg0: i32, %arg1: memref<8xi32, #tpu.memory_space<smem>>) -> (i32, i32) {
    %c0_i32 = arith.constant 0 : i32
    %c0_i32_0 = arith.constant 0 : i32
    %c0_i32_1 = arith.constant 0 : i32
    return %c0_i32, %c0_i32_0 : i32, i32
  }
  func.func @transform_6(%arg0: i32, %arg1: memref<8xi32, #tpu.memory_space<smem>>) -> (i32, i32) {
    %c0_i32 = arith.constant 0 : i32
    %c0_i32_0 = arith.constant 0 : i32
    return %c0_i32, %arg0 : i32, i32
  }
  func.func @transform_7(%arg0: i32, %arg1: memref<8xi32, #tpu.memory_space<smem>>) -> (i32, i32) {
    %c0_i32 = arith.constant 0 : i32
    %c0_i32_0 = arith.constant 0 : i32
    return %c0_i32, %arg0 : i32, i32
  }
  func.func @transform_8(%arg0: i32, %arg1: memref<8xi32, #tpu.memory_space<smem>>) -> (i32, i32) {
    %c0_i32 = arith.constant 0 : i32
    %c0_i32_0 = arith.constant 0 : i32
    return %c0_i32, %arg0 : i32, i32
  }
  func.func @transform_9(%arg0: i32, %arg1: memref<8xi32, #tpu.memory_space<smem>>) -> (i32, i32) {
    %c0_i32 = arith.constant 0 : i32
    %c0_i32_0 = arith.constant 0 : i32
    %c0_i32_1 = arith.constant 0 : i32
    return %c0_i32, %c0_i32_0 : i32, i32
  }
  func.func @transform_10(%arg0: i32, %arg1: memref<8xi32, #tpu.memory_space<smem>>) -> (i32, i32) {
    %c0_i32 = arith.constant 0 : i32
    %c0_i32_0 = arith.constant 0 : i32
    %c0_i32_1 = arith.constant 0 : i32
    return %c0_i32, %c0_i32_0 : i32, i32
  }
}

</mosaic_0001>

<bundles_post_ra>
// kernel: decoder_rnn_forward.1
= control target key start
LH: loop header
LB: loop body
LE: loop exit
PB: predicated region body
PF: predicated region fallthrough
CT: control target
= control target key end

     0   :  { %s4120_s0 = inlined_call_operand.vmem [shape: s32[8], index: 0, kind: input, shape index: {}]   ;;  %s4121_s1 = inlined_call_operand.hbm [shape: f32[3000,128], index: 1, kind: input, shape index: {}]   ;;  %s4122_s2 = inlined_call_operand.vmem [shape: f32[8,128], index: 2, kind: input, shape index: {}]   ;;  %s4123_s3 = inlined_call_operand.hbm [shape: bf16[128,384], index: 3, kind: input, shape index: {}]   ;;  %s4124_s4 = inlined_call_operand.hbm [shape: bf16[128,384], index: 4, kind: input, shape index: {}]   ;;  %s4125_s5 = inlined_call_operand.hbm [shape: f32[1,384], index: 5, kind: input, shape index: {}]   ;;  %s4126_s6 = inlined_call_operand.hbm [shape: f32[1,384], index: 6, kind: input, shape index: {}]   ;;  %s4127_s7 = inlined_call_operand.hbm [shape: bf16[128,3072], index: 7, kind: input, shape index: {}]   ;;  %s4128_s8 = inlined_call_operand.hbm [shape: f32[1,3072], index: 8, kind: input, shape index: {}]   ;;  %s4129_s9 = inlined_call_operand.vmem [shape: f32[8,3072], index: 9, kind: output, shape index: {0}]   ;;  %s4130_s10 = inlined_call_operand.vmem [shape: f32[8,1], index: 10, kind: output, shape index: {1}]   ;;  %s4131_s11 = inlined_call_operand.vmem [shape: f32[8,128], index: 11, kind: output, shape index: {2}]  }
   0x1   :  { %4143 = sst [smem:[#allocation51_spill]] %s4122_s2  ;;  %s17_s19 = sshll.u32 %s4120_s0, 4  ;;  %s18_s19 = int_to_ptr.vmem [resolvable:$true] %s17_s19 }
   0x2   :  { %4144 = sst [smem:[#allocation52_spill]] %s4123_s3  ;;  %s2946_s20 = scalar_lea.vmem %s18_s19, 16 }
   0x3   :  { %4145 = sst [smem:[#allocation53_spill]] %s4130_s10  ;;  %p2947_p0 = scmp.ne.s32.totalorder %s18_s19, %s2946_s20 }
   0x4   :  { %4146 = sst [smem:[#allocation54_spill]] %s4131_s11  ;;  %p2951_p1 = scmp.lt.s32.totalorder %s18_s19, %s18_s19 }
   0x5   :  { %p2952_p2 = scmp.lt.s32.totalorder %s2946_s20, %s2946_s20 }
   0x7   :  { %p2953_p3 = por %p2952_p2, %p2951_p1 }
   0x9   :  { %p2954_p4 = pnand %p2953_p3, %p2947_p0 }
   0xb   :  { %2957 = shalt.err (!%p2954_p4)  }
   0xc   :  { %s3388_s21 = smov [#allocation8]  }
   0xd   :  { %20 = dma.vmem_to_smem %s18_s19, 16, %s3388_s21, [#allocation7] }
   0xe   :  { %3338 = dma.done.wait [#allocation7], 16 }
   0xf   :  { %3339 = vsyncadd [#allocation7], 4294967280 }
  0x10   :  { %22 = sfence }
  0x11   :  { %23 = vsyncpa [#allocation10], 0 }
  0x12   :  { %24 = vsyncpa [#allocation12], 0 }
  0x13   :  { %25 = vsyncpa [#allocation15], 0  ;;  %s3476_s22 = smov 0   ;;  %s3478_s23 = smov 0  }
  0x14   :  { %s3480_s0 = smov 0   ;;  %s3482_s24 = smov 0  }
  0x15 LB: > { %s3495_s25 = sadd.s32 4294967295, %s3386_s24   ;;  %s3498_s26 = sadd.s32 1, %s3386_s24   ;;  %s3386_s24 = sphi %s3482_s24, %s4175_s24   ;;  %s3382_s0 = sphi %s3480_s0, %s4179_s0   ;;  %s3378_s23 = sphi %s3478_s23, %s4178_s23   ;;  %s3374_s22 = sphi %s3476_s22, %s4177_s22  }
  0x16   : > { %4147 = sst [smem:[#allocation49_spill]] %s3498_s26  ;;  %s140_s27 = ssub.s32 %s3386_s24, %s3498_s26 }
  0x17   : > { %s143_s28 = sadd.s32 1, %s3382_s0  ;;  %p141_p5 = scmp.eq.s32.totalorder %s140_s27, 0 }
  0x18   : > { %p150_p6 = scmp.ne.s32.totalorder %s3382_s0, %s3378_s23  ;;  %p151_p7 = scmp.eq.s32.totalorder %s3386_s24, 0 }
  0x19   : > { %p156_p8 = scmp.ne.s32.totalorder %s3378_s23, %s3374_s22  ;;  %p4132_p10 = scmp.eq.s32.totalorder %s3495_s25, 0 }
  0x1a   : > { %s3508_s29 = scalar_select %p141_p5, %s3382_s0, %s143_s28  }
  0x1b   : > { %p3510_p9 = por %p151_p7, %p150_p6  ;;  %p2338_p11 = scmp.ge.s32.totalorder %s3386_s24, 1 }
  0x1c   : > { %4148 = sst [smem:[#allocation50_spill]] %s3508_s29  ;;  %p261_p12 = scmp.lt.s32.totalorder %s3386_s24, 3 }
  0x1d   : > { %p3519_p13 = por %p4132_p10, %p156_p8  ;;  %s3389_s14 = smov [#allocation9]  }
  0x1e   : > { %p3524_p1 = pnand %p2338_p11, %p261_p12  ;;  %s276_s15 = sshll.u32 %s3389_s14, 4  ;;  %s277_s15 = int_to_ptr.vmem [resolvable:$true] %s276_s15 }
  0x1f   : > { %s4150_s12 = scalar_select %p3519_p13, 1, 0 }
  0x20   : > { %s4151_s13 = scalar_select %p3524_p1, 1, 0 }
  0x21   : > { %p2617_p2 = pneg %p3524_p1  ;;  %p2641_p4 = scmp.lt.s32.totalorder %s3386_s24, 2 }
  0x22   : > { %s4154_s3 = sld [smem:[#allocation52_spill]] }
  0x23   : > { %p3532_p3 = pnand %p2617_p2, %p4132_p10  ;;  %p3540_p5 = pnand %p2641_p4, %p3510_p9 }
  0x25   : > { %s4152_s16 = scalar_select %p3532_p3, 1, 0 }
  0x26   : > { %s4153_s18 = scalar_select %p3540_p5, 1, 0 }
  0x27   : > { %p3552_p7 = pneg %p3532_p3 }
  0x28   : > { %s2958_s21 = scalar_lea.hbm %s4154_s3, 3072 }
  0x29   : > { %p2959_p6 = scmp.ne.s32.totalorder %s4154_s3, %s2958_s21  ;;  %p2965_p11 = scmp.lt.u32.totalorder %s2958_s21, %s4154_s3 }
  0x2b   : > { %p2961_p8 = pnand %p3552_p7, %p2959_p6 }
  0x2d   : > { %p2962_p9 = pneg %p2961_p8 }
  0x2f   : > { %p2967_p12 = pnand %p2965_p11, %p2962_p9 }
  0x31   : > { %2970 = shalt.err (!%p2967_p12)
}
  0x32   : > { %s2971_s19 = scalar_lea.vmem %s277_s15, 3072  ;;  %p2979_p10 = scmp.lt.s32.totalorder %s277_s15, %s277_s15 }
  0x33   : > { %p2972_p2 = scmp.ne.s32.totalorder %s277_s15, %s2971_s19  ;;  %p2980_p13 = scmp.lt.s32.totalorder %s2971_s19, %s2971_s19 }
  0x35   : > { %p2974_p4 = pnand %p2972_p2, %p3552_p7  ;;  %p2981_p1 = por %p2980_p13, %p2979_p10 }
  0x37   : > { %p2975_p0 = pneg %p2974_p4 }
  0x39   : > { %p2982_p5 = pnand %p2981_p1, %p2975_p0 }
  0x3b   : > { %2985 = shalt.err (!%p2982_p5)
}
  0x3c   : > { %s3390_s20 = smov 192   ;;  %s3391_s22 = smov 12  }
  0x3d   : > { %2620 = dma.hbm_to_vmem [thread:$0]  (!%p3532_p3), %s4154_s3, 3072, %s277_s15, [#allocation10], %s3390_s20, %s3390_s20, %s3391_s22  }
  0x3e   : > { %s3392_s30 = smov [#allocation11]   ;;  %s2986_s26 = scalar_lea.hbm %s4124_s4, 3072 }
  0x3f   : > { %s289_s14 = sshll.u32 %s3392_s30, 4  ;;  %p2987_p10 = scmp.ne.s32.totalorder %s4124_s4, %s2986_s26  ;;  %s290_s14 = int_to_ptr.vmem [resolvable:$true] %s289_s14 }
  0x40   : > { %p2993_p1 = scmp.lt.u32.totalorder %s2986_s26, %s4124_s4 }
  0x41   : > { %p2989_p13 = pnand %p2987_p10, %p3552_p7 }
  0x43   : > { %p2990_p0 = pneg %p2989_p13 }
  0x45   : > { %p2995_p5 = pnand %p2993_p1, %p2990_p0 }
  0x47   : > { %2998 = shalt.err (!%p2995_p5)
}
  0x48   : > { %s2999_s15 = scalar_lea.vmem %s290_s14, 3072  ;;  %p3007_p11 = scmp.lt.s32.totalorder %s290_s14, %s290_s14 }
  0x49   : > { %p3000_p6 = scmp.ne.s32.totalorder %s290_s14, %s2999_s15  ;;  %p3008_p12 = scmp.lt.s32.totalorder %s2999_s15, %s2999_s15 }
  0x4b   : > { %p3002_p8 = pnand %p3000_p6, %p3552_p7  ;;  %p3009_p2 = por %p3008_p12, %p3007_p11 }
  0x4d   : > { %p3003_p9 = pneg %p3002_p8 }
  0x4f   : > { %p3010_p4 = pnand %p3009_p2, %p3003_p9 }
  0x51   : > { %3013 = shalt.err (!%p3010_p4)
}
  0x52   : > { %2623 = dma.hbm_to_vmem [thread:$0]  (!%p3532_p3), %s4124_s4, 3072, %s290_s14, [#allocation12], %s3390_s20, %s3390_s20, %s3391_s22  }
  0x53   : > { %s4140_s2 = sand.u32 1, %s3382_s0   ;;  %s2525_s11 = smul.u32 768, %s3386_s24 }
  0x54   : > { %s2593_s26 = smul.u32 768, %s4140_s2  ;;  %s3393_s15 = smov [#allocation13]  }
  0x55   : > { %s3593_s21 = scalar_lea.hbm %s4127_s7, %s2525_s11  ;;  %s3597_s10 = sshll.u32 %s3393_s15, 4  ;;  %s304_s10 = int_to_ptr.vmem [resolvable:$true] %s3597_s10 }
  0x56   : > { %s329_s30 = scalar_lea.vmem [#allocation16], %s2593_s26  ;;  %s4156_s20 = sand.u32 1, %s3386_s24  }
  0x57   : > { %s336_s19 = sshll.u32 %s329_s30, 4  ;;  %s3601_s22 = scalar_lea.sflag [#allocation10], %s4156_s20  ;;  %s3595_s19 = int_to_ptr.vmem [resolvable:$true] %s336_s19 }
  0x58   : > { %s3014_s14 = scalar_lea.hbm %s3593_s21, 12288  ;;  %p4157_p13 = scmp.ne.s32.totalorder %s4153_s18, 0 }
  0x59   : > { %p3015_p10 = scmp.ne.s32.totalorder %s3593_s21, %s3014_s14  ;;  %s3019_s26 = scalar_lea.hbm %s4127_s7, 24576 }
  0x5a   : > { %p4141_p0 = pneg %p4157_p13  ;;  %p3020_p6 = scmp.lt.u32.totalorder %s3593_s21, %s4127_s7 }
  0x5b   : > { %p3021_p8 = scmp.lt.u32.totalorder %s3019_s26, %s3014_s14  ;;  %p3023_p11 = scmp.lt.u32.totalorder %s3014_s14, %s3593_s21 }
  0x5c   : > { %p3017_p1 = pnand %p4141_p0, %p3015_p10 }
  0x5d   : > { %p3022_p9 = por %p3021_p8, %p3020_p6 }
  0x5e   : > { %p3018_p5 = pneg %p3017_p1 }
  0x5f   : > { %p3024_p12 = por %p3023_p11, %p3022_p9 }
  0x61   : > { %p3025_p2 = pnand %p3024_p12, %p3018_p5 }
  0x63   : > { %3028 = shalt.err (!%p3025_p2)
}
  0x64   : > { %s3029_s30 = scalar_lea.vmem %s3595_s19, 12288  ;;  %s3394_s15 = smov [#allocation16]  }
  0x65   : > { %p3030_p4 = scmp.ne.s32.totalorder %s3595_s19, %s3029_s30  ;;  %s3034_s20 = sshll.u32 %s3394_s15, 4  ;;  %s3035_s20 = int_to_ptr.vmem [resolvable:$false] %s3034_s20 }
  0x66   : > { %s3036_s29 = scalar_lea.vmem %s3035_s20, 24576  ;;  %p3037_p3 = scmp.lt.s32.totalorder %s3595_s19, %s3035_s20 }
  0x67   : > { %p3032_p10 = pnand %p3030_p4, %p4141_p0  ;;  %p3038_p6 = scmp.lt.s32.totalorder %s3036_s29, %s3029_s30 }
  0x69   : > { %p3033_p1 = pneg %p3032_p10  ;;  %p3039_p8 = por %p3038_p6, %p3037_p3 }
  0x6b   : > { %p3040_p9 = pnand %p3039_p8, %p3033_p1 }
  0x6d   : > { %3043 = shalt.err (!%p3040_p9)
}
  0x6e   : > { %s3395_s14 = smov 1536   ;;  %s3396_s11 = smov 768  }
  0x6f   : > { %s3397_s26 = smov 48   ;;  %s3044_s15 = scalar_lea.hbm %s4125_s5, 48 }
  0x70   : > { %2633 = dma.hbm_to_vmem [thread:$0]  (!%p4157_p13), %s3593_s21, 12288, %s3595_s19, %s3601_s22, %s3395_s14, %s3396_s11, %s3397_s26  }
  0x71   : > { %p3045_p3 = scmp.ne.s32.totalorder %s4125_s5, %s3044_s15  ;;  %p3051_p12 = scmp.lt.u32.totalorder %s3044_s15, %s4125_s5 }
  0x73   : > { %p3047_p5 = pnand %p3045_p3, %p3552_p7 }
  0x75   : > { %p3048_p11 = pneg %p3047_p5 }
  0x77   : > { %p3053_p2 = pnand %p3051_p12, %p3048_p11 }
  0x79   : > { %3056 = shalt.err (!%p3053_p2)
}
  0x7a   : > { %s3057_s3 = scalar_lea.vmem %s304_s10, 48  ;;  %s3064_s21 = scalar_lea.vmem %s304_s10, 64 }
  0x7b   : > { %p3058_p4 = scmp.ne.s32.totalorder %s304_s10, %s3057_s3  ;;  %p3065_p6 = scmp.lt.s32.totalorder %s304_s10, %s304_s10 }
  0x7c   : > { %p3066_p8 = scmp.lt.s32.totalorder %s3064_s21, %s3057_s3 }
  0x7d   : > { %p3060_p10 = pnand %p3058_p4, %p3552_p7 }
  0x7e   : > { %p3067_p9 = por %p3066_p8, %p3065_p6 }
  0x7f   : > { %p3061_p1 = pneg %p3060_p10 }
  0x81   : > { %p3068_p0 = pnand %p3067_p9, %p3061_p1 }
  0x83   : > { %3071 = shalt.err (!%p3068_p0)
}
  0x84   : > { %p4158_p3 = scmp.ne.s32.totalorder %s4152_s16, 0  ;;  %s3398_s2 = smov [#allocation14]  }
  0x85   : > { %s314_s11 = sshll.u32 %s3398_s2, 4  ;;  %s4159_s26 = sand.u32 1, %s3382_s0   ;;  %s315_s11 = int_to_ptr.vmem [resolvable:$true] %s314_s11 }
  0x86   : > { %2626 = dma.hbm_to_vmem [thread:$0]  (!%p4158_p3), %s4125_s5, 48, %s304_s10, [#allocation12]  }
  0x87   : > { %s2594_s17 = smul.u32 12, %s4159_s26  ;;  %s3072_s30 = scalar_lea.hbm %s4126_s6, 48 }
  0x88   : > { %s2526_s27 = smul.u32 192, %s3386_s24  ;;  %p3073_p0 = scmp.ne.s32.totalorder %s4126_s6, %s3072_s30 }
  0x89   : > { %p3079_p12 = scmp.lt.u32.totalorder %s3072_s30, %s4126_s6 }
  0x8a   : > { %p3075_p5 = pnand %p3073_p0, %p3552_p7 }
  0x8c   : > { %p3076_p11 = pneg %p3075_p5 }
  0x8e   : > { %p3081_p2 = pnand %p3079_p12, %p3076_p11 }
  0x90   : > { %3084 = shalt.err (!%p3081_p2)
}
  0x91   : > { %s3085_s10 = scalar_lea.vmem %s315_s11, 48  ;;  %s3092_s24 = scalar_lea.vmem %s315_s11, 64 }
  0x92   : > { %p3086_p4 = scmp.ne.s32.totalorder %s315_s11, %s3085_s10  ;;  %p3093_p6 = scmp.lt.s32.totalorder %s315_s11, %s315_s11 }
  0x93   : > { %p3094_p8 = scmp.lt.s32.totalorder %s3092_s24, %s3085_s10 }
  0x94   : > { %p3088_p10 = pnand %p3086_p4, %p3552_p7 }
  0x95   : > { %p3095_p9 = por %p3094_p8, %p3093_p6 }
  0x96   : > { %p3089_p1 = pneg %p3088_p10 }
  0x98   : > { %p3096_p13 = pnand %p3095_p9, %p3089_p1 }
  0x9a   : > { %3099 = shalt.err (!%p3096_p13)
}
  0x9b   : > { %2629 = dma.hbm_to_vmem [thread:$0]  (!%p4158_p3), %s4126_s6, 48, %s315_s11, [#allocation15]  }
  0x9c   : > { %s3672_s3 = scalar_lea.hbm %s4128_s8, %s2526_s27  ;;  %s350_s28 = scalar_lea.vmem [#allocation17], %s2594_s17 }
  0x9d   : > { %s358_s30 = sshll.u32 %s350_s28, 4  ;;  %s3100_s20 = scalar_lea.hbm %s3672_s3, 192  ;;  %s359_s30 = int_to_ptr.vmem [resolvable:$true] %s358_s30 }
  0x9e   : > { %p3101_p7 = scmp.ne.s32.totalorder %s3672_s3, %s3100_s20  ;;  %p4160_p13 = scmp.ne.s32.totalorder %s4153_s18, 0 }
  0x9f   : > { %s3105_s29 = scalar_lea.hbm %s4128_s8, 384  ;;  %p3106_p3 = scmp.lt.u32.totalorder %s3672_s3, %s4128_s8 }
  0xa0   : > { %p4161_p0 = pneg %p4160_p13  ;;  %p3107_p12 = scmp.lt.u32.totalorder %s3105_s29, %s3100_s20 }
  0xa1   : > { %p3109_p4 = scmp.lt.u32.totalorder %s3100_s20, %s3672_s3 }
  0xa2   : > { %p3103_p5 = pnand %p3101_p7, %p4161_p0  ;;  %p3108_p2 = por %p3107_p12, %p3106_p3 }
  0xa4   : > { %p3104_p11 = pneg %p3103_p5  ;;  %p3110_p10 = por %p3109_p4, %p3108_p2 }
  0xa6   : > { %p3111_p1 = pnand %p3110_p10, %p3104_p11 }
  0xa8   : > { %3114 = shalt.err (!%p3111_p1)
}
  0xa9   : > { %s3115_s17 = scalar_lea.vmem %s359_s30, 192  ;;  %p4162_p8 = pmov %p4161_p0 }
  0xaa   : > { %p3116_p6 = scmp.ne.s32.totalorder %s359_s30, %s3115_s17  ;;  %s3399_s19 = smov [#allocation17]  }
  0xab   : > { %s3120_s10 = sshll.u32 %s3399_s19, 4  ;;  %s3121_s10 = int_to_ptr.vmem [resolvable:$false] %s3120_s10 }
  0xac   : > { %p3118_p9 = pnand %p3116_p6, %p4162_p8  ;;  %s3122_s24 = scalar_lea.vmem %s3121_s10, 384 }
  0xad   : > { %p3123_p0 = scmp.lt.s32.totalorder %s359_s30, %s3121_s10  ;;  %p3124_p5 = scmp.lt.s32.totalorder %s3122_s24, %s3115_s17 }
  0xae   : > { %p3119_p7 = pneg %p3118_p9 }
  0xaf   : > { %p3125_p3 = por %p3124_p5, %p3123_p0 }
  0xb1   : > { %p3126_p12 = pnand %p3125_p3, %p3119_p7 }
  0xb3   : > { %3129 = shalt.err (!%p3126_p12)
}
  0xb4   : > { %2636 = dma.hbm_to_vmem [thread:$0]  (!%p4160_p13), %s3672_s3, 192, %s359_s30, %s3601_s22  }
  0xb5   : > { %p4163_p11 = scmp.ne.s32.totalorder %s4151_s13, 0 }
  0xb6   : > { %p4164_p2 = scmp.eq.s32.totalorder (!%p4163_p11), %s3495_s25, 0 }
  0xb7   : > { %367 = sbr.rel (%p4163_p11) target bundleno = 1645 (0x66d), region = 48 }
  0xbe   : > { %3341 = dma.done.wait (%p4164_p2), [#allocation10], 3072   ;;  %p4165_p4 = pmov %p4164_p2 }
  0xbf   : > { %p4166_p10 = pmov %p4164_p2 }
  0xc0   : > { %3343 = vsyncadd (%p4165_p4), [#allocation10], 4294964224 }
  0xc1   : > { %3345 = dma.done.wait (%p4166_p10), [#allocation12], 3120   ;;  %p4167_p1 = pmov %p4164_p2 }
  0xc3   : > { %3347 = vsyncadd (%p4167_p1), [#allocation12], 4294964176  ;;  %p4168_p6 = pmov %p4167_p1 }
  0xc4   : > { %p4169_p13 = pmov %p4167_p1 }
  0xc5   : > { %3349 = dma.done.wait (%p4168_p6), [#allocation15], 48  }
  0xc6   : > { %3351 = vsyncadd (%p4169_p13), [#allocation15], 4294967248  ;;  %s385_s13 = sand.u32 1, %s3495_s25   ;;  %s387_s18 = sand.u32 1, %s3378_s23  }
  0xc7   : > { %s2595_s22 = smul.u32 768, %s387_s18  ;;  %s386_s14 = scalar_lea.sflag [#allocation10], %s385_s13 }
  0xc8   : > { %p4170_p8 = scmp.ne.s32.totalorder %s4150_s12, 0 }
  0xc9   : > { %s3710_s2 = scalar_lea.vmem [#allocation16], %s2595_s22 }
  0xca   : > { %3353 = dma.done.wait (%p4170_p8), %s386_s14, 12480  }
  0xcb   : > { %3355 = vsyncadd (%p4170_p8), %s386_s14, 4294954816  ;;  %s3716_s26 = smul.u32 12, %s387_s18  ;;  %p4171_p7 = scmp.ne.s32.totalorder %s3495_s25, 0 }
  0xcc   : > { %s440_s15 = smul.u32 12, %s3495_s25  ;;  %v3400_v0 = vmov (!%p4171_p7), 0.0   ;;  %v2701_v1 = vld [vmem:[#allocation11 + $0x8] ss:$12 sps:$4 sm:$0xff] (!%p4171_p7)   ;;  %vm3401_vm0 = vmmov (!%p4171_p7), 0   ;;  %s451_s12 = sld [smem:[#allocation8]] (!%p4171_p7)  ;;  %v613_v11 = vlaneseq (!%p4171_p7) }
  0xcd   : > { %s398_s16 = scalar_lea.vmem [#allocation17], %s3716_s26  ;;  %450 = sbr.rel (%p4171_p7) target bundleno = 847 (0x34f), region = 76  ;;  %2545 = vmatprep.subr.bf16.mxu1 (!%p4171_p7), %v3400_v0  ;;  %2561 = vmatprep.mubr.msk.bf16.mxu1 (!%p4171_p7), %vm3401_vm0, %v3400_v0  ;;  %v2702_v2 = vld [vmem:[#allocation11 + $0x20] ss:$12 sps:$4 sm:$0xff] (!%p4171_p7)   ;;  %v2703_v3 = vld [vmem:[#allocation11 + $0x38] ss:$12 sps:$4 sm:$0xff] (!%p4171_p7)  }
  0xce   : > { %p441_p9 = scmp.lt.s32.totalorder %s440_s15, 23  ;;  %2546 = vmatpush3.bf16.msra.mxu1 (!%p4171_p7), %v2701_v1  ;;  %v2709_v4 = vld [vmem:[#allocation11 + $0x4] ss:$12 sps:$4 sm:$0xff] (!%p4171_p7)   ;;  %v2711_v5 = vld [vmem:[#allocation11] ss:$12 sps:$4 sm:$0xff] (!%p4171_p7)   ;;  %s3402_s11 = smov (!%p4171_p7), [#allocation2]  }
  0xcf   : > { %2547 = vmatprep.subr.bf16.mxu1 (!%p4171_p7), %v3400_v0  ;;  %v2712_v6 = vld [vmem:[#allocation11 + $0x1c] ss:$12 sps:$4 sm:$0xff] (!%p4171_p7)   ;;  %s468_s29 = sshll.u32 (!%p4171_p7), %s3402_s11, 4  ;;  %756 = vmatprep.subr.bf16.mxu0 (!%p4171_p7), %v2709_v4  ;;  %s3732_s21 = sld [smem:[#allocation8 + $0x1]] (!%p4171_p7)  ;;  %v2714_v8 = vld [vmem:[#allocation11 + $0x18] ss:$12 sps:$4 sm:$0xff] (!%p4171_p7)   ;;  %s3735_s29 = int_to_ptr.vmem [resolvable:$true] %s468_s29 }
  0xd0   : > { %s4181_s15 = smov (!%p441_p9, %s440_s15), 23  ;;  %v2704_v7 = vld [vmem:[#allocation11 + $0x50] ss:$12 sps:$4 sm:$0xff] (!%p4171_p7)   ;;  %757 = vmatpush1.bf16.msra.mxu0 (!%p4171_p7), %v2711_v5  ;;  %s3403_s27 = smov (!%p4171_p7), [#allocation2 + $0x1]   ;;  %v2715_v9 = vld [vmem:[#allocation11 + $0x34] ss:$12 sps:$4 sm:$0xff] (!%p4171_p7)  }
  0xd1   : > { %s2351_s3 = sshll.u32 %s4181_s15, 3  ;;  %s483_s17 = sshll.u32 (!%p4171_p7), %s3403_s27, 4  ;;  %758 = vmatprep.subr.bf16.mxu0 (!%p4171_p7), %v2712_v6  ;;  %v2705_v10 = vld [vmem:[#allocation11 + $0x68] ss:$12 sps:$4 sm:$0xff] (!%p4171_p7)   ;;  %v2717_v12 = vld [vmem:[#allocation11 + $0x30] ss:$12 sps:$4 sm:$0xff] (!%p4171_p7)   ;;  %s3737_s17 = int_to_ptr.vmem [resolvable:$true] %s483_s17 }
  0xd2   : > { %s3722_s20 = scalar_lea.vmem %s4129_s9, %s2351_s3  ;;  %2548 = vmatpush3.bf16.msra.mxu1 (!%p4171_p7), %v2702_v2  ;;  %s2360_s19 = sshll.u32 (!%p4171_p7), %s451_s12, 4  ;;  %v2718_v13 = vld [vmem:[#allocation11 + $0x4c] ss:$12 sps:$4 sm:$0xff] (!%p4171_p7)  }
  0xd3   : > { %2549 = vmatprep.subr.bf16.mxu1 (!%p4171_p7), %v3400_v0  ;;  %s3404_s10 = smov (!%p4171_p7), [#allocation2 + $0x2]   ;;  %s460_s22 = scalar_lea.hbm (!%p4171_p7), %s4121_s1, %s2360_s19 }
  0xd4   : > { %s498_s24 = sshll.u32 %s3404_s10, 4  ;;  %s3742_s14 = sld [smem:[#allocation8 + $0x2]]  ;;  %759 = vmatpush1.bf16.msra.mxu0 %v2714_v8  ;;  %s3745_s24 = int_to_ptr.vmem [resolvable:$true] %s498_s24 }
  0xd5   : > { %760 = vmatprep.subr.bf16.mxu0 %v2715_v9  ;;  %s3130_s15 = scalar_lea.hbm %s460_s22, 16  ;;  %s3750_s30 = scalar_lea.hbm %s4121_s1, 48000 }
  0xd6   : > { %2550 = vmatpush3.bf16.msra.mxu1 %v2703_v3  ;;  %p3131_p0 = scmp.ne.s32.totalorder %s460_s22, %s3130_s15  ;;  %p3133_p5 = scmp.lt.u32.totalorder %s460_s22, %s4121_s1 }
  0xd7   : > { %2551 = vmatprep.subr.bf16.mxu1 %v3400_v0  ;;  %p3134_p3 = scmp.lt.u32.totalorder %s3750_s30, %s3130_s15  ;;  %p3136_p11 = scmp.lt.u32.totalorder %s3130_s15, %s460_s22 }
  0xd9   : > { %p3135_p12 = por %p3134_p3, %p3133_p5 }
  0xda   : > { %2552 = vmatpush3.bf16.msra.mxu1 %v2704_v7 }
  0xdb   : > { %2553 = vmatprep.subr.bf16.mxu1 %v3400_v0  ;;  %p3137_p2 = por %p3136_p11, %p3135_p12 }
  0xdd   : > { %p3138_p4 = pnand %p3137_p2, %p3131_p0 }
  0xdf   : > { %3141 = shalt.err (!%p3138_p4)  }
  0xe0   : > { %s3142_s27 = scalar_lea.vmem %s3735_s29, 16  ;;  %s3759_s19 = scalar_lea.vmem %s3735_s29, 128 }
  0xe1   : > { %p3143_p10 = scmp.ne.s32.totalorder %s3735_s29, %s3142_s27  ;;  %p3147_p1 = scmp.lt.s32.totalorder %s3735_s29, %s3735_s29 }
  0xe2   : > { %p3148_p6 = scmp.lt.s32.totalorder %s3759_s19, %s3142_s27 }
  0xe4   : > { %p3149_p13 = por %p3148_p6, %p3147_p1 }
  0xe6   : > { %p3150_p8 = pnand %p3149_p13, %p3143_p10 }
  0xe8   : > { %3153 = shalt.err (!%p3150_p8)  }
  0xe9   : > { %471 = dma.hbm_to_vmem [thread:$0]  %s460_s22, 16, %s3735_s29, [#allocation6]  ;;  %2554 = vmatpush3.bf16.msra.mxu1 %v2705_v10  ;;  %v2706_v14 = vld [vmem:[#allocation11 + $0x80] ss:$12 sps:$4 sm:$0xff]   ;;  %v3771_v15 = vshrl.u32 %v613_v11, 7  ;;  %761 = vmatpush1.bf16.msra.mxu0 %v2717_v12 }
  0xea   : > { %s2361_s10 = sshll.u32 %s3732_s21, 4  ;;  %s3766_s13 = sld [smem:[#allocation8 + $0x3]]  ;;  %2555 = vmatprep.subr.bf16.mxu1 %v3400_v0  ;;  %v2720_v16 = vld [vmem:[#allocation11 + $0x48] ss:$12 sps:$4 sm:$0xff]  }
  0xeb   : > { %s473_s3 = scalar_lea.hbm %s4121_s1, %s2361_s10  ;;  %s3405_s28 = smov [#allocation2 + $0x3]  }
  0xec   : > { %s513_s12 = sshll.u32 %s3405_s28, 4  ;;  %s3154_s11 = scalar_lea.hbm %s473_s3, 16  ;;  %s3785_s12 = int_to_ptr.vmem [resolvable:$true] %s513_s12 }
  0xed   : > { %p3155_p9 = scmp.ne.s32.totalorder %s473_s3, %s3154_s11  ;;  %p3157_p7 = scmp.lt.u32.totalorder %s473_s3, %s4121_s1 }
  0xee   : > { %p3158_p0 = scmp.lt.u32.totalorder %s3750_s30, %s3154_s11  ;;  %p3160_p3 = scmp.lt.u32.totalorder %s3154_s11, %s473_s3 }
  0xf0   : > { %p3159_p5 = por %p3158_p0, %p3157_p7 }
  0xf2   : > { %p3161_p12 = por %p3160_p3, %p3159_p5 }
  0xf4   : > { %p3162_p11 = pnand %p3161_p12, %p3155_p9 }
  0xf6   : > { %3165 = shalt.err (!%p3162_p11)  }
  0xf7   : > { %s3166_s27 = scalar_lea.vmem %s3737_s17, 16  ;;  %p3171_p4 = scmp.lt.s32.totalorder %s3737_s17, %s3735_s29 }
  0xf8   : > { %p3167_p2 = scmp.ne.s32.totalorder %s3737_s17, %s3166_s27  ;;  %p3172_p10 = scmp.lt.s32.totalorder %s3759_s19, %s3166_s27 }
  0xfa   : > { %p3173_p1 = por %p3172_p10, %p3171_p4 }
  0xfc   : > { %p3174_p6 = pnand %p3173_p1, %p3167_p2 }
  0xfe   : > { %3177 = shalt.err (!%p3174_p6)  }
  0xff   : > { %486 = dma.hbm_to_vmem [thread:$0]  %s473_s3, 16, %s3737_s17, [#allocation6 + $0x1]  ;;  %762 = vmatprep.subr.bf16.mxu0 %v2718_v13  ;;  %v2721_v17 = vld [vmem:[#allocation11 + $0x64] ss:$12 sps:$4 sm:$0xff]   ;;  %v615_v18 = vsub.s32 0, %v3771_v15  ;;  %v619_v19 = vsub.s32 1, %v3771_v15  ;;  %2556 = vmatpush3.bf16.msra.mxu1 %v2706_v14 }
 0x100   : > { %s2362_s10 = sshll.u32 %s3742_s14, 4  ;;  %s3792_s11 = sld [smem:[#allocation8 + $0x4]]  ;;  %v3794_v20 = vld [vmem:[#allocation14] sm:$0x7] }
 0x101   : > { %s488_s28 = scalar_lea.hbm %s4121_s1, %s2362_s10  ;;  %v2707_v21 = vld [vmem:[#allocation11 + $0x98] ss:$12 sps:$4 sm:$0xff]  }
 0x102   : > { %s3178_s17 = scalar_lea.hbm %s488_s28, 16  ;;  %p3181_p8 = scmp.lt.u32.totalorder %s488_s28, %s4121_s1 }
 0x103   : > { %p3179_p13 = scmp.ne.s32.totalorder %s488_s28, %s3178_s17  ;;  %p3182_p9 = scmp.lt.u32.totalorder %s3750_s30, %s3178_s17 }
 0x104   : > { %p3184_p0 = scmp.lt.u32.totalorder %s3178_s17, %s488_s28 }
 0x105   : > { %p3183_p7 = por %p3182_p9, %p3181_p8 }
 0x107   : > { %p3185_p5 = por %p3184_p0, %p3183_p7 }
 0x109   : > { %p3186_p3 = pnand %p3185_p5, %p3179_p13 }
 0x10b   : > { %3189 = shalt.err (!%p3186_p3)  }
 0x10c   : > { %s3190_s22 = scalar_lea.vmem %s3745_s24, 16  ;;  %p3195_p11 = scmp.lt.s32.totalorder %s3745_s24, %s3735_s29 }
 0x10d   : > { %p3191_p12 = scmp.ne.s32.totalorder %s3745_s24, %s3190_s22  ;;  %p3196_p2 = scmp.lt.s32.totalorder %s3759_s19, %s3190_s22 }
 0x10f   : > { %p3197_p4 = por %p3196_p2, %p3195_p11 }
 0x111   : > { %p3198_p10 = pnand %p3197_p4, %p3191_p12 }
 0x113   : > { %3201 = shalt.err (!%p3198_p10)  }
 0x114   : > { %501 = dma.hbm_to_vmem [thread:$0]  %s488_s28, 16, %s3745_s24, [#allocation6 + $0x2]  ;;  %v3809_v22 = vrot.slane %v3794_v20, %v615_v18  ;;  %v3814_v23 = vrot.slane %v3794_v20, %v619_v19  ;;  %2557 = vmatprep.subr.bf16.mxu1 %v3400_v0  ;;  %763 = vmatpush1.bf16.msra.mxu0 %v2720_v16  ;;  %v2723_v24 = vld [vmem:[#allocation11 + $0x60] ss:$12 sps:$4 sm:$0xff]   ;;  %v2724_v25 = vld [vmem:[#allocation11 + $0x7c] ss:$12 sps:$4 sm:$0xff]  }
 0x115   : > { %s2363_s21 = sshll.u32 %s3766_s13, 4  ;;  %764 = vmatprep.subr.bf16.mxu0 %v2721_v17  ;;  %s3406_s18 = smov [#allocation2 + $0x4]  }
 0x116   : > { %s503_s24 = scalar_lea.hbm %s4121_s1, %s2363_s21  ;;  %s528_s15 = sshll.u32 %s3406_s18, 4  ;;  %s529_s15 = int_to_ptr.vmem [resolvable:$true] %s528_s15 }
 0x117   : > { %s3202_s28 = scalar_lea.hbm %s503_s24, 16  ;;  %p3205_p6 = scmp.lt.u32.totalorder %s503_s24, %s4121_s1 }
 0x118   : > { %p3203_p1 = scmp.ne.s32.totalorder %s503_s24, %s3202_s28  ;;  %p3206_p13 = scmp.lt.u32.totalorder %s3750_s30, %s3202_s28 }
 0x119   : > { %p3208_p9 = scmp.lt.u32.totalorder %s3202_s28, %s503_s24 }
 0x11a   : > { %p3207_p8 = por %p3206_p13, %p3205_p6 }
 0x11c   : > { %p3209_p7 = por %p3208_p9, %p3207_p8 }
 0x11e   : > { %p3210_p0 = pnand %p3209_p7, %p3203_p1 }
 0x120   : > { %3213 = shalt.err (!%p3210_p0)  }
 0x121   : > { %s3214_s13 = scalar_lea.vmem %s3785_s12, 16  ;;  %p3219_p3 = scmp.lt.s32.totalorder %s3785_s12, %s3735_s29 }
 0x122   : > { %p3215_p5 = scmp.ne.s32.totalorder %s3785_s12, %s3214_s13  ;;  %p3220_p12 = scmp.lt.s32.totalorder %s3759_s19, %s3214_s13 }
 0x124   : > { %p3221_p11 = por %p3220_p12, %p3219_p3 }
 0x126   : > { %p3222_p2 = pnand %p3221_p11, %p3215_p5 }
 0x128   : > { %3225 = shalt.err (!%p3222_p2)  }
 0x129   : > { %516 = dma.hbm_to_vmem [thread:$0]  %s503_s24, 16, %s3785_s12, [#allocation6 + $0x3]  ;;  %2558 = vmatpush3.bf16.msra.mxu1 %v2707_v21  ;;  %v2708_v26 = vld [vmem:[#allocation11 + $0xb0] ss:$12 sps:$4 sm:$0xff]   ;;  %765 = vmatpush1.bf16.msra.mxu0 %v2723_v24  ;;  %v2726_v28 = vld [vmem:[#allocation11 + $0x78] ss:$12 sps:$4 sm:$0xff]  }
 0x12a   : > { %s4172_s21 = sld [smem:[#allocation51_spill]]  ;;  %2559 = vmatprep.subr.bf16.mxu1 %v3400_v0  ;;  %s2364_s27 = sshll.u32 %s3792_s11, 4  ;;  %766 = vmatprep.subr.bf16.mxu0 %v2724_v25  ;;  %v603_v29 = vld [vmem:[#allocation11 + $0x90] sm:$0xff]  ;;  %v605_v30 = vld [vmem:[#allocation11 + $0x9c] sm:$0xff] }
 0x12b   : > { %v2727_v31 = vld [vmem:[#allocation11 + $0x94] ss:$12 sps:$4 sm:$0xff]   ;;  %s518_s24 = scalar_lea.hbm %s4121_s1, %s2364_s27 }
 0x12c   : > { %s3226_s18 = scalar_lea.hbm %s518_s24, 16  ;;  %p3229_p10 = scmp.lt.u32.totalorder %s518_s24, %s4121_s1 }
 0x12d   : > { %p3227_p4 = scmp.ne.s32.totalorder %s518_s24, %s3226_s18  ;;  %p3230_p1 = scmp.lt.u32.totalorder %s3750_s30, %s3226_s18 }
 0x12e   : > { %p3232_p13 = scmp.lt.u32.totalorder %s3226_s18, %s518_s24 }
 0x12f   : > { %p3231_p6 = por %p3230_p1, %p3229_p10 }
 0x130   : > { %v3834_v27 = vld [vmem:[%s4172_s21] sm:$0xff] }
 0x131   : > { %v578_v32 = vpack.c.bf16 %v3834_v27, %v3834_v27  ;;  %p3233_p8 = por %p3232_p13, %p3231_p6 }
 0x133   : > { %p3234_p9 = pnand %p3233_p8, %p3227_p4 }
 0x135   : > { %3237 = shalt.err (!%p3234_p9)  }
 0x136   : > { %s3238_s11 = scalar_lea.vmem %s529_s15, 16  ;;  %p3243_p0 = scmp.lt.s32.totalorder %s529_s15, %s3735_s29 }
 0x137   : > { %p3239_p7 = scmp.ne.s32.totalorder %s529_s15, %s3238_s11  ;;  %p3244_p5 = scmp.lt.s32.totalorder %s3759_s19, %s3238_s11 }
 0x139   : > { %p3245_p3 = por %p3244_p5, %p3243_p0 }
 0x13b   : > { %p3246_p12 = pnand %p3245_p3, %p3239_p7 }
 0x13d   : > { %3249 = shalt.err (!%p3246_p12)  }
 0x13e   : > { %531 = dma.hbm_to_vmem [thread:$0]  %s518_s24, 16, %s529_s15, [#allocation6 + $0x4]  ;;  %2560 = vmatpush3.bf16.msra.mxu1 %v2708_v26  ;;  %767 = vmatpush1.bf16.msra.mxu0 %v2726_v28  ;;  %v2386_v33 = vcombine.low %v603_v29, %v605_v30  ;;  %v607_v34 = vld [vmem:[#allocation11 + $0xa8] sm:$0xff]  ;;  %v609_v35 = vld [vmem:[#allocation11 + $0xb4] sm:$0xff] }
 0x13f   : > { %768 = vmatprep.subr.bf16.mxu0 %v2727_v31  ;;  %v2729_v36 = vld [vmem:[#allocation11 + $0xac] ss:$12 sps:$4 sm:$0xff]   ;;  %v2389_v37 = vcombine.low %v607_v34, %v609_v35  ;;  %s2357_s3 = sld [smem:[#allocation8 + $0x5]]  ;;  %s2358_s13 = sld [smem:[#allocation8 + $0x6]] }
 0x140   : > { %s3849_s14 = sld [smem:[#allocation8 + $0x7]]  ;;  %s3407_s21 = smov [#allocation2 + $0x5]  }
 0x141   : > { %2562 = vmatmul.mubr.bf16.vlgmr.msra.gmra.mrb[0].mxu1 %v578_v32  ;;  %s543_s15 = sshll.u32 %s3407_s21, 4  ;;  %s544_s15 = int_to_ptr.vmem [resolvable:$true] %s543_s15 }
 0x142   : > { %769 = vmatpush1.bf16.msra.mxu0 %v2386_v33 }
 0x143   : > { %770 = vmatprep.subr.bf16.mxu0 %v2729_v36 }
 0x145   : > { %s2365_s22 = sshll.u32 %s2357_s3, 4 }
 0x146   : > { %771 = vmatpush1.bf16.msra.mxu0 %v2389_v37  ;;  %s533_s12 = scalar_lea.hbm %s4121_s1, %s2365_s22 }
 0x147   : > { %s3250_s24 = scalar_lea.hbm %s533_s12, 16  ;;  %p3253_p2 = scmp.lt.u32.totalorder %s533_s12, %s4121_s1 }
 0x148   : > { %p3251_p11 = scmp.ne.s32.totalorder %s533_s12, %s3250_s24  ;;  %p3254_p4 = scmp.lt.u32.totalorder %s3750_s30, %s3250_s24 }
 0x149   : > { %p3256_p1 = scmp.lt.u32.totalorder %s3250_s24, %s533_s12 }
 0x14a   : > { %p3255_p10 = por %p3254_p4, %p3253_p2 }
 0x14c   : > { %p3257_p6 = por %p3256_p1, %p3255_p10 }
 0x14e   : > { %p3258_p13 = pnand %p3257_p6, %p3251_p11 }
 0x150   : > { %3261 = shalt.err (!%p3258_p13)  }
 0x151   : > { %s3262_s17 = scalar_lea.vmem %s544_s15, 16  ;;  %p3267_p9 = scmp.lt.s32.totalorder %s544_s15, %s3735_s29 }
 0x152   : > { %p3263_p8 = scmp.ne.s32.totalorder %s544_s15, %s3262_s17  ;;  %p3268_p7 = scmp.lt.s32.totalorder %s3759_s19, %s3262_s17 }
 0x154   : > { %p3269_p0 = por %p3268_p7, %p3267_p9 }
 0x156   : > { %p3270_p5 = pnand %p3269_p0, %p3263_p8 }
 0x158   : > { %3273 = shalt.err (!%p3270_p5)  }
 0x159   : > { %546 = dma.hbm_to_vmem [thread:$0]  %s533_s12, 16, %s544_s15, [#allocation6 + $0x5]  ;;  %v3408_v38 = vmov 0  }
 0x15a   : > { %s2366_s11 = sshll.u32 %s2358_s13, 4  ;;  %788 = vmatprep.mubr.bf16.mxu0 %v3408_v38  ;;  %s3409_s27 = smov [#allocation2 + $0x6]  }
 0x15b   : > { %s548_s21 = scalar_lea.hbm %s4121_s1, %s2366_s11  ;;  %s558_s10 = sshll.u32 %s3409_s27, 4  ;;  %789 = vmatmul.mubr.bf16.vlgmr.msra.gmra.mrb[0].mxu0 %v578_v32  ;;  %s559_s10 = int_to_ptr.vmem [resolvable:$true] %s558_s10 }
 0x15c   : > { %s2367_s24 = sshll.u32 %s3849_s14, 4  ;;  %s3274_s18 = scalar_lea.hbm %s548_s21, 16 }
 0x15d   : > { %p3275_p3 = scmp.ne.s32.totalorder %s548_s21, %s3274_s18  ;;  %p3277_p12 = scmp.lt.u32.totalorder %s548_s21, %s4121_s1 }
 0x15e   : > { %p3278_p11 = scmp.lt.u32.totalorder %s3750_s30, %s3274_s18  ;;  %p3280_p4 = scmp.lt.u32.totalorder %s3274_s18, %s548_s21 }
 0x160   : > { %p3279_p2 = por %p3278_p11, %p3277_p12 }
 0x162   : > { %p3281_p10 = por %p3280_p4, %p3279_p2 }
 0x164   : > { %p3282_p1 = pnand %p3281_p10, %p3275_p3 }
 0x166   : > { %3285 = shalt.err (!%p3282_p1)  }
 0x167   : > { %s3286_s13 = scalar_lea.vmem %s559_s10, 16  ;;  %p3291_p13 = scmp.lt.s32.totalorder %s559_s10, %s3735_s29 }
 0x168   : > { %p3287_p6 = scmp.ne.s32.totalorder %s559_s10, %s3286_s13  ;;  %p3292_p8 = scmp.lt.s32.totalorder %s3759_s19, %s3286_s13 }
 0x16a   : > { %p3293_p9 = por %p3292_p8, %p3291_p13 }
 0x16c   : > { %p3294_p7 = pnand %p3293_p9, %p3287_p6 }
 0x16e   : > { %3297 = shalt.err (!%p3294_p7)  }
 0x16f   : > { %561 = dma.hbm_to_vmem [thread:$0]  %s548_s21, 16, %s559_s10, [#allocation6 + $0x6] }
 0x170   : > { %s563_s12 = scalar_lea.hbm %s4121_s1, %s2367_s24  ;;  %s3410_s11 = smov [#allocation2 + $0x7]  }
 0x171   : > { %s573_s3 = sshll.u32 %s3410_s11, 4  ;;  %s3298_s22 = scalar_lea.hbm %s563_s12, 16  ;;  %s574_s3 = int_to_ptr.vmem [resolvable:$true] %s573_s3 }
 0x172   : > { %p3299_p0 = scmp.ne.s32.totalorder %s563_s12, %s3298_s22  ;;  %p3301_p5 = scmp.lt.u32.totalorder %s563_s12, %s4121_s1 }
 0x173   : > { %p3302_p3 = scmp.lt.u32.totalorder %s3750_s30, %s3298_s22  ;;  %p3304_p11 = scmp.lt.u32.totalorder %s3298_s22, %s563_s12 }
 0x175   : > { %p3303_p12 = por %p3302_p3, %p3301_p5 }
 0x177   : > { %p3305_p2 = por %p3304_p11, %p3303_p12 }
 0x179   : > { %p3306_p4 = pnand %p3305_p2, %p3299_p0 }
 0x17b   : > { %3309 = shalt.err (!%p3306_p4)  }
 0x17c   : > { %s3310_s21 = scalar_lea.vmem %s574_s3, 16  ;;  %p3315_p1 = scmp.lt.s32.totalorder %s574_s3, %s3735_s29 }
 0x17d   : > { %p3311_p10 = scmp.ne.s32.totalorder %s574_s3, %s3310_s21  ;;  %p3316_p6 = scmp.lt.s32.totalorder %s3759_s19, %s3310_s21 }
 0x17f   : > { %p3317_p13 = por %p3316_p6, %p3315_p1 }
 0x181   : > { %p3318_p8 = pnand %p3317_p13, %p3311_p10 }
 0x183   : > { %3321 = shalt.err (!%p3318_p8)  }
 0x184   : > { %576 = dma.hbm_to_vmem [thread:$0]  %s563_s12, 16, %s574_s3, [#allocation6 + $0x7]  ;;  %v623_v39 = vsub.s32 2, %v3771_v15 }
 0x186   : > { %v624_v40 = vrot.slane %v3794_v20, %v623_v39 }
 0x214   : > { %v831_v41 = vpop.f32.mrb[0].mxu1 }
 0x215   : > { %v3884_v42 = vadd.f32 %v831_v41, %v624_v40  ;;  %v2563_v43 = vpop.f32.mrb[1].mxu1 }
 0x216   : > { %v834_v44 = vpop.f32.mrb[2].mxu1 }
 0x217   : > { %v2564_v45 = vpop.f32.mrb[3].mxu1 }
 0x218   : > { %3356 = dma.done.wait [#allocation6], 16 }
 0x219   : > { %3357 = vsyncadd [#allocation6], 4294967280 }
 0x21a   : > { %3358 = dma.done.wait [#allocation6 + $0x1], 16 }
 0x21b   : > { %3359 = vsyncadd [#allocation6 + $0x1], 4294967280 }
 0x21c   : > { %3360 = dma.done.wait [#allocation6 + $0x2], 16 }
 0x21d   : > { %3361 = vsyncadd [#allocation6 + $0x2], 4294967280 }
 0x21e   : > { %3362 = dma.done.wait [#allocation6 + $0x3], 16 }
 0x21f   : > { %3363 = vsyncadd [#allocation6 + $0x3], 4294967280 }
 0x220   : > { %3364 = dma.done.wait [#allocation6 + $0x4], 16 }
 0x221   : > { %3365 = vsyncadd [#allocation6 + $0x4], 4294967280 }
 0x222   : > { %3366 = dma.done.wait [#allocation6 + $0x5], 16 }
 0x223   : > { %3367 = vsyncadd [#allocation6 + $0x5], 4294967280 }
 0x224   : > { %3368 = dma.done.wait [#allocation6 + $0x6], 16 }
 0x225   : > { %3369 = vsyncadd [#allocation6 + $0x6], 4294967280 }
 0x226   : > { %3370 = dma.done.wait [#allocation6 + $0x7], 16 }
 0x227   : > { %3371 = vsyncadd [#allocation6 + $0x7], 4294967280  ;;  %vm1138_vm1 = vcmask 7168   ;;  %2565 = vmatprep.subr.bf16.mxu1 %v3400_v0  ;;  %1065 = vmatprep.mubr.bf16.mxu0 %v3408_v38  ;;  %v3411_v46 = vmov -1e+30   ;;  %v854_v5 = vld [vmem:[#allocation2] sm:$0xff] }
 0x228   : > { %1139 = vst.msk [vmem:[#allocation4] sm:$0xff] %vm1138_vm1, %v3411_v46  ;;  %1140 = vst.msk [vmem:[#allocation5] sm:$0xff] %vm1138_vm1, %v3400_v0  ;;  %2581 = vmatprep.mubr.msk.bf16.mxu1 %vm3401_vm0, %v3400_v0  ;;  %v2731_v47 = vld [vmem:[#allocation9 + $0x4] ss:$12 sps:$4 sm:$0xff]   ;;  %v2733_v48 = vld [vmem:[#allocation9] ss:$12 sps:$4 sm:$0xff]   ;;  %v855_v7 = vpack.c.bf16 %v854_v5, %v854_v5 }
 0x229   : > { %1033 = vmatprep.subr.bf16.mxu0 %v2731_v47  ;;  %v2734_v49 = vld [vmem:[#allocation9 + $0x1c] ss:$12 sps:$4 sm:$0xff]   ;;  %v2736_v50 = vld [vmem:[#allocation9 + $0x18] ss:$12 sps:$4 sm:$0xff]   ;;  %v2737_v51 = vld [vmem:[#allocation9 + $0x34] ss:$12 sps:$4 sm:$0xff]  }
 0x22a   : > { %1034 = vmatpush1.bf16.msra.mxu0 %v2733_v48  ;;  %v2739_v52 = vld [vmem:[#allocation9 + $0x30] ss:$12 sps:$4 sm:$0xff]   ;;  %v2740_v53 = vld [vmem:[#allocation9 + $0x4c] ss:$12 sps:$4 sm:$0xff]   ;;  %v2752_v54 = vld [vmem:[#allocation9 + $0x8] ss:$12 sps:$4 sm:$0xff]  }
 0x22b   : > { %1035 = vmatprep.subr.bf16.mxu0 %v2734_v49  ;;  %v2742_v55 = vld [vmem:[#allocation9 + $0x48] ss:$12 sps:$4 sm:$0xff]   ;;  %v2743_v56 = vld [vmem:[#allocation9 + $0x64] ss:$12 sps:$4 sm:$0xff]   ;;  %2566 = vmatpush3.bf16.msra.mxu1 %v2752_v54  ;;  %v2756_v57 = vld [vmem:[#allocation9 + $0x20] ss:$12 sps:$4 sm:$0xff]  }
 0x22c   : > { %2567 = vmatprep.subr.bf16.mxu1 %v3400_v0  ;;  %v2745_v58 = vld [vmem:[#allocation9 + $0x60] ss:$12 sps:$4 sm:$0xff]   ;;  %v2746_v59 = vld [vmem:[#allocation9 + $0x7c] ss:$12 sps:$4 sm:$0xff]   ;;  %v2757_v60 = vld [vmem:[#allocation9 + $0x38] ss:$12 sps:$4 sm:$0xff]  }
 0x22d   : > { %v2748_v61 = vld [vmem:[#allocation9 + $0x78] ss:$12 sps:$4 sm:$0xff]   ;;  %v2749_v62 = vld [vmem:[#allocation9 + $0x94] ss:$12 sps:$4 sm:$0xff]   ;;  %v2758_v63 = vld [vmem:[#allocation9 + $0x50] ss:$12 sps:$4 sm:$0xff]  }
 0x22e   : > { %1036 = vmatpush1.bf16.msra.mxu0 %v2736_v50  ;;  %v2751_v1 = vld [vmem:[#allocation9 + $0x90] ss:$12 sps:$4 sm:$0xff]   ;;  %v2753_v2 = vld [vmem:[#allocation9 + $0xac] ss:$12 sps:$4 sm:$0xff]   ;;  %v2759_v3 = vld [vmem:[#allocation9 + $0x68] ss:$12 sps:$4 sm:$0xff]  }
 0x22f   : > { %1037 = vmatprep.subr.bf16.mxu0 %v2737_v51  ;;  %2568 = vmatpush3.bf16.msra.mxu1 %v2756_v57  ;;  %v2755_v4 = vld [vmem:[#allocation9 + $0xa8] ss:$12 sps:$4 sm:$0xff]   ;;  %v2760_v6 = vld [vmem:[#allocation9 + $0x80] ss:$12 sps:$4 sm:$0xff]   ;;  %v2761_v8 = vld [vmem:[#allocation9 + $0x98] ss:$12 sps:$4 sm:$0xff]  }
 0x230   : > { %2569 = vmatprep.subr.bf16.mxu1 %v3400_v0  ;;  %v2762_v9 = vld [vmem:[#allocation9 + $0xb0] ss:$12 sps:$4 sm:$0xff]   ;;  %v888_v10 = vld [vmem:[#allocation13] sm:$0x7]  ;;  %s4173_s19 = sld [smem:[#allocation54_spill]] }
 0x231   : > { %v893_v11 = vrot.slane %v888_v10, %v615_v18  ;;  %v897_v12 = vrot.slane %v888_v10, %v619_v19 }
 0x232   : > { %1038 = vmatpush1.bf16.msra.mxu0 %v2739_v52 }
 0x233   : > { %1039 = vmatprep.subr.bf16.mxu0 %v2740_v53  ;;  %2570 = vmatpush3.bf16.msra.mxu1 %v2757_v60  ;;  %v2585_v13 = vadd.f32 %v893_v11, %v3809_v22  ;;  %v2587_v16 = vadd.f32 %v897_v12, %v3814_v23  ;;  %v901_v23 = vrot.slane %v888_v10, %v623_v39 }
 0x234   : > { %2571 = vmatprep.subr.bf16.mxu1 %v3400_v0 }
 0x236   : > { %1040 = vmatpush1.bf16.msra.mxu0 %v2742_v55 }
 0x237   : > { %1041 = vmatprep.subr.bf16.mxu0 %v2743_v56  ;;  %2572 = vmatpush3.bf16.msra.mxu1 %v2758_v63 }
 0x238   : > { %2573 = vmatprep.subr.bf16.mxu1 %v3400_v0 }
 0x23a   : > { %1042 = vmatpush1.bf16.msra.mxu0 %v2745_v58 }
 0x23b   : > { %1043 = vmatprep.subr.bf16.mxu0 %v2746_v59  ;;  %2574 = vmatpush3.bf16.msra.mxu1 %v2759_v3 }
 0x23c   : > { %2575 = vmatprep.subr.bf16.mxu1 %v3400_v0 }
 0x23e   : > { %1044 = vmatpush1.bf16.msra.mxu0 %v2748_v61 }
 0x23f   : > { %1045 = vmatprep.subr.bf16.mxu0 %v2749_v62  ;;  %2576 = vmatpush3.bf16.msra.mxu1 %v2760_v6 }
 0x240   : > { %2577 = vmatprep.subr.bf16.mxu1 %v3400_v0 }
 0x242   : > { %1046 = vmatpush1.bf16.msra.mxu0 %v2751_v1 }
 0x243   : > { %1047 = vmatprep.subr.bf16.mxu0 %v2753_v2  ;;  %2578 = vmatpush3.bf16.msra.mxu1 %v2761_v8 }
 0x244   : > { %2579 = vmatprep.subr.bf16.mxu1 %v3400_v0 }
 0x246   : > { %1048 = vmatpush1.bf16.msra.mxu0 %v2755_v4 }
 0x247   : > { %2580 = vmatpush3.bf16.msra.mxu1 %v2762_v9 }
 0x249   : > { %1066 = vmatmul.mubr.bf16.vlgmr.msra.gmra.mrb[0].mxu0 %v855_v7 }
 0x24a   : > { %2582 = vmatmul.mubr.bf16.vlgmr.msra.gmra.mrb[4].mxu1 %v855_v7 }
 0x31c   : > { %v1067_v14 = vpop.f32.mrb[0].mxu0 }
 0x31d   : > { %v2586_v17 = vadd.f32 %v2585_v13, %v1067_v14  ;;  %v1069_v20 = vpop.f32.mrb[1].mxu0  ;;  %v1108_v28 = vpop.f32.mrb[4].mxu1 }
 0x31e   : > { %v1071_v21 = vpop.f32.mrb[2].mxu0  ;;  %v2588_v0 = vadd.f32 %v2587_v16, %v1069_v20  ;;  %v2583_v29 = vpop.f32.mrb[5].mxu1  ;;  %v1109_v33 = vadd.f32 %v1108_v28, %v901_v23 }
 0x31f   : > { %v2416_v24 = vmul.f32 -1.442695, %v2586_v17  ;;  %v1072_v25 = vpop.f32.mrb[3].mxu0  ;;  %v1111_v30 = vpop.f32.mrb[6].mxu1 }
 0x320   : > { %v2417_v26 = vmul.f32 -1.442695, %v2588_v0  ;;  %v2584_v18 = vpop.f32.mrb[7].mxu1 }
 0x321   : > { %2763 = vpow2.f32 %v2416_v24 }
 0x322   : > { %2765 = vpow2.f32 %v2417_v26 }
 0x32b   : > { %v2764_v31 = vpop.eup %2763 }
 0x32c   : > { %v1118_v19 = vadd.f32 1.0, %v2764_v31  ;;  %v2766_v22 = vpop.eup %2765 }
 0x32d   : > { %v1125_v32 = vadd.f32 1.0, %v2766_v22 }
 0x32e   : > { %2767 = vrcp.f32 %v1118_v19 }
 0x32f   : > { %2769 = vrcp.f32 %v1125_v32 }
 0x338   : > { %v2768_v34 = vpop.eup %2767 }
 0x339   : > { %v1128_v35 = vmul.f32 %v2768_v34, %v3884_v42  ;;  %v2770_v37 = vpop.eup %2769 }
 0x33a   : > { %v1131_v38 = vsub.f32 1.0, %v2770_v37  ;;  %v1133_v41 = vmul.f32 %v2770_v37, %v3834_v27 }
 0x33b   : > { %v1129_v36 = vadd.f32 %v1128_v35, %v1109_v33 }
 0x33d   : > { %2771 = vtanh.f32 %v1129_v36 }
 0x347   : > { %v2772_v40 = vpop.eup %2771 }
 0x348   : > { %v1132_v43 = vmul.f32 %v2772_v40, %v1131_v38 }
 0x34a   : > { %v1134_v44 = vadd.f32 %v1133_v41, %v1132_v43 }
 0x34c   : > { %1135 = vst [vmem:[%s4173_s19] sm:$0xff] %v1134_v44  ;;  %v1136_v15 = vpack.c.bf16 %v1134_v44, %v1134_v44 }
 0x34e   : > { %1137 = vst [vmem:[#allocation3] sm:$0xf] %v1136_v15 }
 0x34f PF: > { %v2774_v39 = vld [vmem:[%s3710_s2 + $0x4] ss:$48 sps:$4 sm:$0xff]   ;;  %v2776_v42 = vld [vmem:[%s3710_s2 + $0xc] ss:$48 sps:$4 sm:$0xff]   ;;  %v3412_v27 = vmov 0   ;;  %vm2115_vm2 = vcmask 7168  }
 0x350   : > { %1814 = vmatprep.mubr.bf16.mxu0 %v3412_v27  ;;  %1855 = vmatprep.mubr.bf16.mxu1 %v3412_v27  ;;  %v2778_v45 = vld [vmem:[%s3710_s2] ss:$48 sps:$4 sm:$0xff]   ;;  %v2779_v46 = vld [vmem:[%s3710_s2 + $0x8] ss:$48 sps:$4 sm:$0xff]   ;;  %v2780_v47 = vld [vmem:[%s3710_s2 + $0x64] ss:$48 sps:$4 sm:$0xff]  }
 0x351   : > { %1782 = vmatprep.subr.bf16.mxu0 %v2774_v39  ;;  %2773 = vset.pattern.permute.xlu0 %v3412_v27  ;;  %v2782_v48 = vld [vmem:[%s3710_s2 + $0x6c] ss:$48 sps:$4 sm:$0xff]   ;;  %v2784_v49 = vld [vmem:[%s3710_s2 + $0x60] ss:$48 sps:$4 sm:$0xff]   ;;  %v2785_v50 = vld [vmem:[%s3710_s2 + $0x68] ss:$48 sps:$4 sm:$0xff]  }
 0x352   : > { %1823 = vmatprep.subr.bf16.mxu1 %v2776_v42  ;;  %1783 = vmatpush1.bf16.msra.mxu0 %v2778_v45  ;;  %v2786_v51 = vld [vmem:[%s3710_s2 + $0xc4] ss:$48 sps:$4 sm:$0xff]   ;;  %v2788_v52 = vld [vmem:[%s3710_s2 + $0xcc] ss:$48 sps:$4 sm:$0xff]   ;;  %v2790_v53 = vld [vmem:[%s3710_s2 + $0xc0] ss:$48 sps:$4 sm:$0xff]  }
 0x353   : > { %1824 = vmatpush1.bf16.msra.mxu1 %v2779_v46  ;;  %1784 = vmatprep.subr.bf16.mxu0 %v2780_v47  ;;  %v2791_v54 = vld [vmem:[%s3710_s2 + $0xc8] ss:$48 sps:$4 sm:$0xff]   ;;  %v2792_v55 = vld [vmem:[%s3710_s2 + $0x124] ss:$48 sps:$4 sm:$0xff]   ;;  %v2794_v56 = vld [vmem:[%s3710_s2 + $0x12c] ss:$48 sps:$4 sm:$0xff]  }
 0x354   : > { %1825 = vmatprep.subr.bf16.mxu1 %v2782_v48  ;;  %v2796_v57 = vld [vmem:[%s3710_s2 + $0x120] ss:$48 sps:$4 sm:$0xff]   ;;  %v2797_v58 = vld [vmem:[%s3710_s2 + $0x128] ss:$48 sps:$4 sm:$0xff]   ;;  %v2798_v59 = vld [vmem:[%s3710_s2 + $0x184] ss:$48 sps:$4 sm:$0xff]  }
 0x355   : > { %v2800_v60 = vld [vmem:[%s3710_s2 + $0x18c] ss:$48 sps:$4 sm:$0xff]   ;;  %v2802_v61 = vld [vmem:[%s3710_s2 + $0x180] ss:$48 sps:$4 sm:$0xff]   ;;  %v2803_v62 = vld [vmem:[%s3710_s2 + $0x188] ss:$48 sps:$4 sm:$0xff]  }
 0x356   : > { %1785 = vmatpush1.bf16.msra.mxu0 %v2784_v49  ;;  %v2804_v63 = vld [vmem:[%s3710_s2 + $0x1e4] ss:$48 sps:$4 sm:$0xff]   ;;  %v2806_v1 = vld [vmem:[%s3710_s2 + $0x1ec] ss:$48 sps:$4 sm:$0xff]   ;;  %v2808_v2 = vld [vmem:[%s3710_s2 + $0x1e0] ss:$48 sps:$4 sm:$0xff]  }
 0x357   : > { %1826 = vmatpush1.bf16.msra.mxu1 %v2785_v50  ;;  %1786 = vmatprep.subr.bf16.mxu0 %v2786_v51  ;;  %v2809_v3 = vld [vmem:[%s3710_s2 + $0x1e8] ss:$48 sps:$4 sm:$0xff]   ;;  %v2810_v4 = vld [vmem:[%s3710_s2 + $0x244] ss:$48 sps:$4 sm:$0xff]   ;;  %v2812_v5 = vld [vmem:[%s3710_s2 + $0x24c] ss:$48 sps:$4 sm:$0xff]  }
 0x358   : > { %1827 = vmatprep.subr.bf16.mxu1 %v2788_v52  ;;  %v2814_v6 = vld [vmem:[%s3710_s2 + $0x240] ss:$48 sps:$4 sm:$0xff]   ;;  %v2815_v7 = vld [vmem:[%s3710_s2 + $0x248] ss:$48 sps:$4 sm:$0xff]   ;;  %v2816_v8 = vld [vmem:[%s3710_s2 + $0x2a4] ss:$48 sps:$4 sm:$0xff]  }
 0x359   : > { %v2818_v9 = vld [vmem:[%s3710_s2 + $0x2ac] ss:$48 sps:$4 sm:$0xff]   ;;  %v2820_v10 = vld [vmem:[%s3710_s2 + $0x2a0] ss:$48 sps:$4 sm:$0xff]   ;;  %v2821_v11 = vld [vmem:[%s3710_s2 + $0x2a8] ss:$48 sps:$4 sm:$0xff]  }
 0x35a   : > { %1787 = vmatpush1.bf16.msra.mxu0 %v2790_v53  ;;  %v2824_v12 = vld [vmem:[%s3710_s2 + $0x14] ss:$48 sps:$4 sm:$0xff]   ;;  %v2827_v13 = vld [vmem:[%s3710_s2 + $0x1c] ss:$48 sps:$4 sm:$0xff]   ;;  %v2822_v16 = vld [vmem:[%s3710_s2 + $0x10] ss:$48 sps:$4 sm:$0xff]  }
 0x35b   : > { %1828 = vmatpush1.bf16.msra.mxu1 %v2791_v54  ;;  %1788 = vmatprep.subr.bf16.mxu0 %v2792_v55  ;;  %v3948_v14 = vld [vmem:[#allocation3] sm:$0xf]  ;;  %v2825_v17 = vld [vmem:[%s3710_s2 + $0x18] ss:$48 sps:$4 sm:$0xff]   ;;  %v2833_v21 = vld [vmem:[%s3710_s2 + $0x7c] ss:$48 sps:$4 sm:$0xff]  }
 0x35c   : > { %1829 = vmatprep.subr.bf16.mxu1 %v2794_v56  ;;  %v2830_v20 = vld [vmem:[%s3710_s2 + $0x74] ss:$48 sps:$4 sm:$0xff]   ;;  %v2828_v24 = vld [vmem:[%s3710_s2 + $0x70] ss:$48 sps:$4 sm:$0xff]   ;;  %v2831_v25 = vld [vmem:[%s3710_s2 + $0x78] ss:$48 sps:$4 sm:$0xff]  }
 0x35d   : > { %v2836_v0 = vld [vmem:[%s3710_s2 + $0xd4] ss:$48 sps:$4 sm:$0xff]   ;;  %v2839_v26 = vld [vmem:[%s3710_s2 + $0xdc] ss:$48 sps:$4 sm:$0xff]   ;;  %v2834_v28 = vld [vmem:[%s3710_s2 + $0xd0] ss:$48 sps:$4 sm:$0xff]  }
 0x35e   : > { %1789 = vmatpush1.bf16.msra.mxu0 %v2796_v57  ;;  %v2837_v29 = vld [vmem:[%s3710_s2 + $0xd8] ss:$48 sps:$4 sm:$0xff]   ;;  %v2842_v30 = vld [vmem:[%s3710_s2 + $0x134] ss:$48 sps:$4 sm:$0xff]   ;;  %v2845_v18 = vld [vmem:[%s3710_s2 + $0x13c] ss:$48 sps:$4 sm:$0xff]  }
 0x35f   : > { %1830 = vmatpush1.bf16.msra.mxu1 %v2797_v58  ;;  %1790 = vmatprep.subr.bf16.mxu0 %v2798_v59  ;;  %v2840_v31 = vld [vmem:[%s3710_s2 + $0x130] ss:$48 sps:$4 sm:$0xff]   ;;  %v2843_v19 = vld [vmem:[%s3710_s2 + $0x138] ss:$48 sps:$4 sm:$0xff]   ;;  %v2848_v22 = vld [vmem:[%s3710_s2 + $0x194] ss:$48 sps:$4 sm:$0xff]  }
 0x360   : > { %1831 = vmatprep.subr.bf16.mxu1 %v2800_v60  ;;  %v2851_v23 = vld [vmem:[%s3710_s2 + $0x19c] ss:$48 sps:$4 sm:$0xff]   ;;  %v2846_v32 = vld [vmem:[%s3710_s2 + $0x190] ss:$48 sps:$4 sm:$0xff]   ;;  %v2849_v33 = vld [vmem:[%s3710_s2 + $0x198] ss:$48 sps:$4 sm:$0xff]  }
 0x361   : > { %v2854_v34 = vld [vmem:[%s3710_s2 + $0x1f4] ss:$48 sps:$4 sm:$0xff]   ;;  %v2857_v35 = vld [vmem:[%s3710_s2 + $0x1fc] ss:$48 sps:$4 sm:$0xff]   ;;  %v2852_v36 = vld [vmem:[%s3710_s2 + $0x1f0] ss:$48 sps:$4 sm:$0xff]  }
 0x362   : > { %1791 = vmatpush1.bf16.msra.mxu0 %v2802_v61  ;;  %v2855_v37 = vld [vmem:[%s3710_s2 + $0x1f8] ss:$48 sps:$4 sm:$0xff]   ;;  %v2860_v38 = vld [vmem:[%s3710_s2 + $0x254] ss:$48 sps:$4 sm:$0xff]   ;;  %v2863_v40 = vld [vmem:[%s3710_s2 + $0x25c] ss:$48 sps:$4 sm:$0xff]  }
 0x363   : > { %1832 = vmatpush1.bf16.msra.mxu1 %v2803_v62  ;;  %1792 = vmatprep.subr.bf16.mxu0 %v2804_v63  ;;  %v2858_v41 = vld [vmem:[%s3710_s2 + $0x250] ss:$48 sps:$4 sm:$0xff]   ;;  %v2861_v43 = vld [vmem:[%s3710_s2 + $0x258] ss:$48 sps:$4 sm:$0xff]   ;;  %v2866_v44 = vld [vmem:[%s3710_s2 + $0x2b4] ss:$48 sps:$4 sm:$0xff]  }
 0x364   : > { %1833 = vmatprep.subr.bf16.mxu1 %v2806_v1  ;;  %v2869_v15 = vld [vmem:[%s3710_s2 + $0x2bc] ss:$48 sps:$4 sm:$0xff]   ;;  %v2864_v39 = vld [vmem:[%s3710_s2 + $0x2b0] ss:$48 sps:$4 sm:$0xff]   ;;  %v2867_v42 = vld [vmem:[%s3710_s2 + $0x2b8] ss:$48 sps:$4 sm:$0xff]  }
 0x365   : > { %v2872_v45 = vld [vmem:[%s3710_s2 + $0x24] ss:$48 sps:$4 sm:$0xff]   ;;  %v2875_v46 = vld [vmem:[%s3710_s2 + $0x2c] ss:$48 sps:$4 sm:$0xff]   ;;  %v2870_v47 = vld [vmem:[%s3710_s2 + $0x20] ss:$48 sps:$4 sm:$0xff]  }
 0x366   : > { %1793 = vmatpush1.bf16.msra.mxu0 %v2808_v2  ;;  %v2873_v48 = vld [vmem:[%s3710_s2 + $0x28] ss:$48 sps:$4 sm:$0xff]   ;;  %v2878_v49 = vld [vmem:[%s3710_s2 + $0x84] ss:$48 sps:$4 sm:$0xff]   ;;  %v2881_v50 = vld [vmem:[%s3710_s2 + $0x8c] ss:$48 sps:$4 sm:$0xff]  }
 0x367   : > { %1834 = vmatpush1.bf16.msra.mxu1 %v2809_v3  ;;  %1794 = vmatprep.subr.bf16.mxu0 %v2810_v4  ;;  %v2876_v51 = vld [vmem:[%s3710_s2 + $0x80] ss:$48 sps:$4 sm:$0xff]   ;;  %v2879_v52 = vld [vmem:[%s3710_s2 + $0x88] ss:$48 sps:$4 sm:$0xff]   ;;  %v2884_v53 = vld [vmem:[%s3710_s2 + $0xe4] ss:$48 sps:$4 sm:$0xff]  }
 0x368   : > { %1835 = vmatprep.subr.bf16.mxu1 %v2812_v5  ;;  %v2887_v54 = vld [vmem:[%s3710_s2 + $0xec] ss:$48 sps:$4 sm:$0xff]   ;;  %v2882_v55 = vld [vmem:[%s3710_s2 + $0xe0] ss:$48 sps:$4 sm:$0xff]   ;;  %v2885_v56 = vld [vmem:[%s3710_s2 + $0xe8] ss:$48 sps:$4 sm:$0xff]  }
 0x369   : > { %v2890_v57 = vld [vmem:[%s3710_s2 + $0x144] ss:$48 sps:$4 sm:$0xff]   ;;  %v2893_v58 = vld [vmem:[%s3710_s2 + $0x14c] ss:$48 sps:$4 sm:$0xff]   ;;  %v2888_v59 = vld [vmem:[%s3710_s2 + $0x140] ss:$48 sps:$4 sm:$0xff]  }
 0x36a   : > { %1795 = vmatpush1.bf16.msra.mxu0 %v2814_v6  ;;  %v2891_v60 = vld [vmem:[%s3710_s2 + $0x148] ss:$48 sps:$4 sm:$0xff]   ;;  %v2899_v61 = vld [vmem:[%s3710_s2 + $0x1ac] ss:$48 sps:$4 sm:$0xff]   ;;  %v2894_v62 = vld [vmem:[%s3710_s2 + $0x1a0] ss:$48 sps:$4 sm:$0xff]  }
 0x36b   : > { %1836 = vmatpush1.bf16.msra.mxu1 %v2815_v7  ;;  %1796 = vmatprep.subr.bf16.mxu0 %v2816_v8  ;;  %v2897_v63 = vld [vmem:[%s3710_s2 + $0x1a8] ss:$48 sps:$4 sm:$0xff]   ;;  %v2902_v1 = vld [vmem:[%s3710_s2 + $0x204] ss:$48 sps:$4 sm:$0xff]   ;;  %v2905_v2 = vld [vmem:[%s3710_s2 + $0x20c] ss:$48 sps:$4 sm:$0xff]  }
 0x36c   : > { %1837 = vmatprep.subr.bf16.mxu1 %v2818_v9  ;;  %v2900_v3 = vld [vmem:[%s3710_s2 + $0x200] ss:$48 sps:$4 sm:$0xff]   ;;  %v2903_v4 = vld [vmem:[%s3710_s2 + $0x208] ss:$48 sps:$4 sm:$0xff]   ;;  %v2908_v5 = vld [vmem:[%s3710_s2 + $0x264] ss:$48 sps:$4 sm:$0xff]  }
 0x36d   : > { %v2911_v6 = vld [vmem:[%s3710_s2 + $0x26c] ss:$48 sps:$4 sm:$0xff]   ;;  %v2906_v7 = vld [vmem:[%s3710_s2 + $0x260] ss:$48 sps:$4 sm:$0xff]   ;;  %v2909_v8 = vld [vmem:[%s3710_s2 + $0x268] ss:$48 sps:$4 sm:$0xff]  }
 0x36e   : > { %1797 = vmatpush1.bf16.msra.mxu0 %v2820_v10  ;;  %v2914_v9 = vld [vmem:[%s3710_s2 + $0x2c4] ss:$48 sps:$4 sm:$0xff]   ;;  %v2917_v10 = vld [vmem:[%s3710_s2 + $0x2cc] ss:$48 sps:$4 sm:$0xff]   ;;  %p2514_p9 = scmp.ne.s32.totalorder %s3495_s25, 1 }
 0x36f   : > { %1838 = vmatpush1.bf16.msra.mxu1 %v2821_v11  ;;  %1864 = vmatprep.subr.bf16.mxu0 %v2824_v12  ;;  %v2912_v11 = vld [vmem:[%s3710_s2 + $0x2c0] ss:$48 sps:$4 sm:$0xff]   ;;  %v2915_v12 = vld [vmem:[%s3710_s2 + $0x2c8] ss:$48 sps:$4 sm:$0xff]  }
 0x370   : > { %1905 = vmatprep.subr.bf16.mxu1 %v2827_v13  ;;  %v1242_v13 = vlaneseq }
 0x371   : > { %1815 = vmatmul.mubr.bf16.vlgmr.msra.gmra.mrb[0].mxu0 %v3948_v14 }
 0x372   : > { %1856 = vmatmul.mubr.bf16.vlgmr.msra.gmra.mrb[0].mxu1 %v3948_v14  ;;  %1865 = vmatpush1.bf16.msra.mxu0 %v2822_v16  ;;  %v1243_v16 = vshrl.u32 %v1242_v13, 7 }
 0x373   : > { %1906 = vmatpush1.bf16.msra.mxu1 %v2825_v17  ;;  %1866 = vmatprep.subr.bf16.mxu0 %v2830_v20 }
 0x374   : > { %1907 = vmatprep.subr.bf16.mxu1 %v2833_v21  ;;  %1896 = vmatprep.mubr.bf16.mxu0 %v3412_v27  ;;  %v1244_v17 = vsub.s32 0, %v1243_v16  ;;  %v1252_v20 = vsub.s32 2, %v1243_v16  ;;  %v1238_v21 = vld [vmem:[%s398_s16] sm:$0xff] }
 0x375   : > { %1937 = vmatprep.mubr.bf16.mxu1 %v3412_v27 }
 0x376   : > { %1867 = vmatpush1.bf16.msra.mxu0 %v2828_v24  ;;  %v1248_v24 = vsub.s32 1, %v1243_v16 }
 0x377   : > { %1908 = vmatpush1.bf16.msra.mxu1 %v2831_v25  ;;  %1868 = vmatprep.subr.bf16.mxu0 %v2836_v0  ;;  %v1256_v25 = vsub.s32 3, %v1243_v16  ;;  %v1245_v0 = vrot.slane %v1238_v21, %v1244_v17 }
 0x378   : > { %1909 = vmatprep.subr.bf16.mxu1 %v2839_v26  ;;  %v1253_v26 = vrot.slane %v1238_v21, %v1252_v20 }
 0x37a   : > { %1869 = vmatpush1.bf16.msra.mxu0 %v2834_v28  ;;  %v1249_v28 = vrot.slane %v1238_v21, %v1248_v24 }
 0x37b   : > { %1910 = vmatpush1.bf16.msra.mxu1 %v2837_v29  ;;  %1870 = vmatprep.subr.bf16.mxu0 %v2842_v30  ;;  %v1257_v29 = vrot.slane %v1238_v21, %v1256_v25 }
 0x37c   : > { %1911 = vmatprep.subr.bf16.mxu1 %v2845_v18 }
 0x37e   : > { %1871 = vmatpush1.bf16.msra.mxu0 %v2840_v31 }
 0x37f   : > { %1912 = vmatpush1.bf16.msra.mxu1 %v2843_v19  ;;  %1872 = vmatprep.subr.bf16.mxu0 %v2848_v22 }
 0x380   : > { %1913 = vmatprep.subr.bf16.mxu1 %v2851_v23 }
 0x382   : > { %1873 = vmatpush1.bf16.msra.mxu0 %v2846_v32 }
 0x383   : > { %1914 = vmatpush1.bf16.msra.mxu1 %v2849_v33  ;;  %1874 = vmatprep.subr.bf16.mxu0 %v2854_v34 }
 0x384   : > { %1915 = vmatprep.subr.bf16.mxu1 %v2857_v35 }
 0x386   : > { %1875 = vmatpush1.bf16.msra.mxu0 %v2852_v36 }
 0x387   : > { %1916 = vmatpush1.bf16.msra.mxu1 %v2855_v37  ;;  %1876 = vmatprep.subr.bf16.mxu0 %v2860_v38  ;;  %v1260_v37 = vsub.s32 4, %v1243_v16  ;;  %v1268_v38 = vsub.s32 6, %v1243_v16 }
 0x388   : > { %1917 = vmatprep.subr.bf16.mxu1 %v2863_v40  ;;  %v1264_v40 = vsub.s32 5, %v1243_v16 }
 0x38a   : > { %1877 = vmatpush1.bf16.msra.mxu0 %v2858_v41  ;;  %v1272_v41 = vsub.s32 7, %v1243_v16 }
 0x38b   : > { %1918 = vmatpush1.bf16.msra.mxu1 %v2861_v43  ;;  %1878 = vmatprep.subr.bf16.mxu0 %v2866_v44  ;;  %v1261_v43 = vrot.slane %v1238_v21, %v1260_v37  ;;  %v1269_v44 = vrot.slane %v1238_v21, %v1268_v38 }
 0x38c   : > { %1919 = vmatprep.subr.bf16.mxu1 %v2869_v15  ;;  %v1265_v15 = vrot.slane %v1238_v21, %v1264_v40 }
 0x38e   : > { %1879 = vmatpush1.bf16.msra.mxu0 %v2864_v39  ;;  %v1273_v39 = vrot.slane %v1238_v21, %v1272_v41 }
 0x38f   : > { %1920 = vmatpush1.bf16.msra.mxu1 %v2867_v42  ;;  %1946 = vmatprep.subr.bf16.mxu0 %v2872_v45 }
 0x390   : > { %1987 = vmatprep.subr.bf16.mxu1 %v2875_v46 }
 0x391   : > { %1897 = vmatmul.mubr.bf16.vlgmr.msra.gmra.mrb[4].mxu0 %v3948_v14 }
 0x392   : > { %1938 = vmatmul.mubr.bf16.vlgmr.msra.gmra.mrb[4].mxu1 %v3948_v14  ;;  %1947 = vmatpush1.bf16.msra.mxu0 %v2870_v47 }
 0x393   : > { %1988 = vmatpush1.bf16.msra.mxu1 %v2873_v48  ;;  %1948 = vmatprep.subr.bf16.mxu0 %v2878_v49 }
 0x394   : > { %1989 = vmatprep.subr.bf16.mxu1 %v2881_v50  ;;  %1978 = vmatprep.mubr.bf16.mxu0 %v3412_v27 }
 0x395   : > { %2019 = vmatprep.mubr.bf16.mxu1 %v3412_v27  ;;  %v2896_v27 = vld [vmem:[%s3710_s2 + $0x1a4] ss:$48 sps:$4 sm:$0xff]  }
 0x396   : > { %1949 = vmatpush1.bf16.msra.mxu0 %v2876_v51 }
 0x397   : > { %1990 = vmatpush1.bf16.msra.mxu1 %v2879_v52  ;;  %1950 = vmatprep.subr.bf16.mxu0 %v2884_v53 }
 0x398   : > { %1991 = vmatprep.subr.bf16.mxu1 %v2887_v54 }
 0x39a   : > { %1951 = vmatpush1.bf16.msra.mxu0 %v2882_v55 }
 0x39b   : > { %1992 = vmatpush1.bf16.msra.mxu1 %v2885_v56  ;;  %1952 = vmatprep.subr.bf16.mxu0 %v2890_v57  ;;  %v1239_v56 = vld [vmem:[%s398_s16 + $0x8] sm:$0xf] }
 0x39c   : > { %1993 = vmatprep.subr.bf16.mxu1 %v2893_v58  ;;  %v1277_v57 = vrot.slane %v1239_v56, %v1244_v17  ;;  %v1285_v58 = vrot.slane %v1239_v56, %v1252_v20 }
 0x39e   : > { %1953 = vmatpush1.bf16.msra.mxu0 %v2888_v59  ;;  %v1281_v59 = vrot.slane %v1239_v56, %v1248_v24 }
 0x39f   : > { %1994 = vmatpush1.bf16.msra.mxu1 %v2891_v60  ;;  %1954 = vmatprep.subr.bf16.mxu0 %v2896_v27  ;;  %v1289_v60 = vrot.slane %v1239_v56, %v1256_v25 }
 0x3a0   : > { %1995 = vmatprep.subr.bf16.mxu1 %v2899_v61 }
 0x3a2   : > { %1955 = vmatpush1.bf16.msra.mxu0 %v2894_v62 }
 0x3a3   : > { %1996 = vmatpush1.bf16.msra.mxu1 %v2897_v63  ;;  %1956 = vmatprep.subr.bf16.mxu0 %v2902_v1 }
 0x3a4   : > { %1997 = vmatprep.subr.bf16.mxu1 %v2905_v2 }
 0x3a6   : > { %1957 = vmatpush1.bf16.msra.mxu0 %v2900_v3 }
 0x3a7   : > { %1998 = vmatpush1.bf16.msra.mxu1 %v2903_v4  ;;  %1958 = vmatprep.subr.bf16.mxu0 %v2908_v5 }
 0x3a8   : > { %1999 = vmatprep.subr.bf16.mxu1 %v2911_v6 }
 0x3aa   : > { %1959 = vmatpush1.bf16.msra.mxu0 %v2906_v7 }
 0x3ab   : > { %2000 = vmatpush1.bf16.msra.mxu1 %v2909_v8  ;;  %1960 = vmatprep.subr.bf16.mxu0 %v2914_v9 }
 0x3ac   : > { %2001 = vmatprep.subr.bf16.mxu1 %v2917_v10 }
 0x3ae   : > { %1961 = vmatpush1.bf16.msra.mxu0 %v2912_v11 }
 0x3af   : > { %2002 = vmatpush1.bf16.msra.mxu1 %v2915_v12 }
 0x3b1   : > { %1979 = vmatmul.mubr.bf16.vlgmr.msra.gmra.mrb[8].mxu0 %v3948_v14 }
 0x3b2   : > { %2020 = vmatmul.mubr.bf16.vlgmr.msra.gmra.mrb[8].mxu1 %v3948_v14 }
 0x444   : > { %v1816_v30 = vpop.f32.mrb[0].mxu0 }
 0x445   : > { %v1857_v18 = vpop.f32.mrb[0].mxu1  ;;  %v4024_v31 = vadd.f32 %v1816_v30, %v1245_v0  ;;  %v1818_v19 = vpop.f32.mrb[1].mxu0  ;;  %v4078_v0 = vld [vmem:[#allocation4] sm:$0xff] }
 0x446   : > { %v4026_v14 = vadd.f32 %v1857_v18, %v1253_v26  ;;  %v1859_v22 = vpop.f32.mrb[1].mxu1  ;;  %v4028_v23 = vadd.f32 %v1818_v19, %v1249_v28  ;;  %v1820_v33 = vpop.f32.mrb[2].mxu0 }
 0x447   : > { %v4030_v32 = vadd.f32 %v1859_v22, %v1257_v29  ;;  %v1861_v34 = vpop.f32.mrb[2].mxu1  ;;  %2028 = vst [vmem:[%s3722_s20] sm:$0xff] %v4024_v31  ;;  %v1821_v35 = vpop.f32.mrb[3].mxu0 }
 0x448   : > { %2030 = vst [vmem:[%s3722_s20 + $0x10] sm:$0xff] %v4026_v14  ;;  %v1862_v36 = vpop.f32.mrb[3].mxu1  ;;  %2029 = vst [vmem:[%s3722_s20 + $0x8] sm:$0xff] %v4028_v23 }
 0x449   : > { %2031 = vst [vmem:[%s3722_s20 + $0x18] sm:$0xff] %v4030_v32 }
 0x464   : > { %v1898_v42 = vpop.f32.mrb[4].mxu0 }
 0x465   : > { %v1939_v45 = vpop.f32.mrb[4].mxu1  ;;  %v4040_v46 = vadd.f32 %v1898_v42, %v1261_v43  ;;  %v1900_v48 = vpop.f32.mrb[5].mxu0 }
 0x466   : > { %v4042_v47 = vadd.f32 %v1939_v45, %v1269_v44  ;;  %v1941_v49 = vpop.f32.mrb[5].mxu1  ;;  %v4044_v50 = vadd.f32 %v1900_v48, %v1265_v15  ;;  %v1902_v52 = vpop.f32.mrb[6].mxu0 }
 0x467   : > { %v4046_v51 = vadd.f32 %v1941_v49, %v1273_v39  ;;  %v1943_v53 = vpop.f32.mrb[6].mxu1  ;;  %2032 = vst [vmem:[%s3722_s20 + $0x20] sm:$0xff] %v4040_v46  ;;  %v1903_v54 = vpop.f32.mrb[7].mxu0  ;;  %v2040_v62 = vmax.f32 %v4024_v31, %v4040_v46 }
 0x468   : > { %2034 = vst [vmem:[%s3722_s20 + $0x30] sm:$0xff] %v4042_v47  ;;  %v1944_v55 = vpop.f32.mrb[7].mxu1  ;;  %2033 = vst [vmem:[%s3722_s20 + $0x28] sm:$0xff] %v4044_v50  ;;  %v2042_v63 = vmax.f32 %v4026_v14, %v4042_v47  ;;  %v2041_v5 = vmax.f32 %v4028_v23, %v4044_v50 }
 0x469   : > { %2035 = vst [vmem:[%s3722_s20 + $0x38] sm:$0xff] %v4046_v51  ;;  %v2043_v6 = vmax.f32 %v4030_v32, %v4046_v51 }
 0x484   : > { %v1980_v27 = vpop.f32.mrb[8].mxu0 }
 0x485   : > { %v2021_v61 = vpop.f32.mrb[8].mxu1  ;;  %v1981_v1 = vadd.f32 %v1980_v27, %v1277_v57  ;;  %v1982_v3 = vpop.f32.mrb[9].mxu0 }
 0x486   : > { %v4062_v2 = vadd.f32 %v2021_v61, %v1285_v58  ;;  %v2023_v4 = vpop.f32.mrb[9].mxu1  ;;  %v1983_v7 = vadd.f32 %v1982_v3, %v1281_v59  ;;  %v1984_v9 = vpop.f32.mrb[10].mxu0 }
 0x487   : > { %v4068_v8 = vadd.f32 %v2023_v4, %v1289_v60  ;;  %v2025_v10 = vpop.f32.mrb[10].mxu1  ;;  %2036 = vst [vmem:[%s3722_s20 + $0x40] sm:$0xff] %v1981_v1  ;;  %v1985_v11 = vpop.f32.mrb[11].mxu0  ;;  %v2044_v13 = vmax.f32 %v2040_v62, %v1981_v1 }
 0x488   : > { %2038 = vst [vmem:[%s3722_s20 + $0x50] sm:$0xff] %v4062_v2  ;;  %v2026_v12 = vpop.f32.mrb[11].mxu1  ;;  %v2046_v16 = vmax.f32 %v2042_v63, %v4062_v2  ;;  %2037 = vst [vmem:[%s3722_s20 + $0x48] sm:$0xff] %v1983_v7  ;;  %v2045_v17 = vmax.f32 %v2041_v5, %v1983_v7  ;;  %v2055_v10 = vld [vmem:[#allocation5] sm:$0xff] }
 0x489   : > { %2039 = vst [vmem:[%s3722_s20 + $0x58] sm:$0xff] %v4068_v8  ;;  %v2047_v20 = vmax.f32 %v2043_v6, %v4068_v8  ;;  %s4174_s20 = sld [smem:[#allocation53_spill]] (!%p2514_p9) }
 0x48a   : > { %v2048_v21 = vmax.f32 %v2044_v13, %v2045_v17 }
 0x48b   : > { %v2049_v24 = vmax.f32 %v2046_v16, %v2047_v20 }
 0x48d   : > { %v2050_v25 = vmax.f32 %v2048_v21, %v2049_v24 }
 0x48f   : > { %2051 = vmax.xlane.f32.xlu0 %v2050_v25 }
 0x51c   : > { %v2052_v26 = vpop.xlane.xlu0 %2051 }
 0x51d   : > { %v4081_v28 = vmax.f32 %v4078_v0, %v2052_v26 }
 0x51f   : > { %v2056_v29 = vsub.f32 %v4078_v0, %v4081_v28  ;;  %2117 = vst.msk [vmem:[#allocation4] sm:$0xff] %vm2115_vm2, %v4081_v28  ;;  %2062 = vperm.xlu0 %2773, %v4081_v28  }
 0x526   : > { %v2122_v20 = vld [vmem:[#allocation4] sm:$0xff] (!%p2514_p9) }
 0x59e   : > { %v2063_v30 = vpop.permute.xlu0 %2062 }
 0x59f   : > { %v2065_v18 = vsub.f32 %v4024_v31, %v2063_v30  ;;  %v2066_v19 = vsub.f32 %v4028_v23, %v2063_v30  ;;  %v2067_v22 = vsub.f32 %v4026_v14, %v2063_v30  ;;  %v2068_v33 = vsub.f32 %v4030_v32, %v2063_v30 }
 0x5a0   : > { %v2069_v36 = vsub.f32 %v4040_v46, %v2063_v30  ;;  %v2070_v38 = vsub.f32 %v4044_v50, %v2063_v30  ;;  %v2071_v41 = vsub.f32 %v4042_v47, %v2063_v30  ;;  %v2072_v23 = vsub.f32 %v4046_v51, %v2063_v30 }
 0x5a1   : > { %v2077_v34 = vmul.f32 1.442695, %v2065_v18  ;;  %v2079_v35 = vmul.f32 1.442695, %v2066_v19  ;;  %v2081_v37 = vmul.f32 1.442695, %v2067_v22  ;;  %v2073_v43 = vsub.f32 %v1981_v1, %v2063_v30 }
 0x5a2   : > { %v2083_v40 = vmul.f32 1.442695, %v2068_v33  ;;  %v2085_v31 = vmul.f32 1.442695, %v2069_v36  ;;  %v2087_v14 = vmul.f32 1.442695, %v2070_v38  ;;  %v2074_v44 = vsub.f32 %v1983_v7, %v2063_v30 }
 0x5a3   : > { %2918 = vpow2.f32 %v2077_v34  ;;  %v2089_v32 = vmul.f32 1.442695, %v2071_v41  ;;  %v2091_v15 = vmul.f32 1.442695, %v2072_v23  ;;  %v2075_v45 = vsub.f32 %v4062_v2, %v2063_v30 }
 0x5a4   : > { %2920 = vpow2.f32 %v2079_v35  ;;  %v2093_v46 = vmul.f32 1.442695, %v2073_v43  ;;  %v2076_v49 = vsub.f32 %v4068_v8, %v2063_v30  ;;  %v2095_v50 = vmul.f32 1.442695, %v2074_v44 }
 0x5a5   : > { %2922 = vpow2.f32 %v2081_v37  ;;  %v2097_v53 = vmul.f32 1.442695, %v2075_v45  ;;  %v2057_v8 = vmul.f32 1.442695, %v2056_v29 }
 0x5a6   : > { %2924 = vpow2.f32 %v2083_v40  ;;  %v2099_v56 = vmul.f32 1.442695, %v2076_v49 }
 0x5a7   : > { %2926 = vpow2.f32 %v2085_v31 }
 0x5a8   : > { %2928 = vpow2.f32 %v2087_v14 }
 0x5a9   : > { %2930 = vpow2.f32 %v2089_v32 }
 0x5aa   : > { %2932 = vpow2.f32 %v2091_v15 }
 0x5ab   : > { %2934 = vpow2.f32 %v2093_v46 }
 0x5ac   : > { %2936 = vpow2.f32 %v2095_v50 }
 0x5ad   : > { %v2919_v39 = vpop.eup %2918  ;;  %2938 = vpow2.f32 %v2097_v53 }
 0x5ae   : > { %v2921_v42 = vpop.eup %2920  ;;  %2940 = vpow2.f32 %v2099_v56 }
 0x5af   : > { %v2101_v48 = vadd.f32 %v2921_v42, %v2919_v39  ;;  %v2923_v47 = vpop.eup %2922  ;;  %2942 = vpow2.f32 %v2057_v8 }
 0x5b0   : > { %v2925_v52 = vpop.eup %2924 }
 0x5b1   : > { %v2102_v51 = vadd.f32 %v2923_v47, %v2101_v48  ;;  %v2927_v55 = vpop.eup %2926 }
 0x5b2   : > { %v2929_v58 = vpop.eup %2928 }
 0x5b3   : > { %v2103_v54 = vadd.f32 %v2925_v52, %v2102_v51  ;;  %v2931_v60 = vpop.eup %2930 }
 0x5b4   : > { %v2933_v61 = vpop.eup %2932 }
 0x5b5   : > { %v2104_v57 = vadd.f32 %v2927_v55, %v2103_v54  ;;  %v2935_v63 = vpop.eup %2934 }
 0x5b6   : > { %v2937_v2 = vpop.eup %2936 }
 0x5b7   : > { %v2105_v59 = vadd.f32 %v2929_v58, %v2104_v57  ;;  %v2939_v4 = vpop.eup %2938 }
 0x5b8   : > { %v2941_v6 = vpop.eup %2940 }
 0x5b9   : > { %v2106_v27 = vadd.f32 %v2931_v60, %v2105_v59  ;;  %v2943_v9 = vpop.eup %2942 }
 0x5ba   : > { %v2059_v11 = vmul.f32 %v2943_v9, %v2055_v10 }
 0x5bb   : > { %v2107_v62 = vadd.f32 %v2933_v61, %v2106_v27 }
 0x5bd   : > { %v2108_v1 = vadd.f32 %v2935_v63, %v2107_v62 }
 0x5bf   : > { %v2109_v3 = vadd.f32 %v2937_v2, %v2108_v1 }
 0x5c1   : > { %v2110_v5 = vadd.f32 %v2939_v4, %v2109_v3 }
 0x5c3   : > { %v2111_v7 = vadd.f32 %v2941_v6, %v2110_v5 }
 0x5c5   : > { %2112 = vadd.xlane.f32.xlu1 %v2111_v7 }
 0x64f   : > { %2121 = sbr.rel (%p2514_p9) target bundleno = 1645 (0x66d), region = 112 }
 0x652   : > { %v2113_v12 = vpop.xlane.xlu1 %2112 }
 0x653   : > { %v2114_v13 = vadd.f32 %v2113_v12, %v2059_v11 }
 0x655   : > { %2116 = vst.msk [vmem:[#allocation5] sm:$0xff] %vm2115_vm2, %v2114_v13 }
 0x65c   : > { %v2123_v16 = vld [vmem:[#allocation5] sm:$0xff] }
 0x65d   : > { %2944 = vlog2.f32 %v2123_v16 }
 0x667   : > { %v2945_v17 = vpop.eup %2944 }
 0x668   : > { %v2125_v21 = vmul.f32 0.6931472, %v2945_v17 }
 0x66a   : > { %v2126_v24 = vadd.f32 %v2125_v21, %v2122_v20 }
 0x66c   : > { %2127 = vst.msk [vmem:[%s4174_s20] sm:$0xff] %vm2115_vm2, %v2126_v24 }
 0x66d PF: > { %s4175_s24 = sld [smem:[#allocation49_spill]]  ;;  %s4176_s16 = sld [smem:[#allocation50_spill]] }
 0x66e   : > { %s4177_s22 = smov %s3378_s23  ;;  %s4178_s23 = smov %s3382_s0 }
 0x673   : > { %p28_p7 = scmp.ge.s32.totalorder %s4175_s24, 4   ;;  %s4179_s0 = smov %s4176_s16 }
 0x675   :  { %30 = sbr.rel (!%p28_p7) target bundleno = 21 (0x15), region = 199 }
 0x67c   :  { %2162 = vsyncpa [#allocation10], 1 }
 0x67d   :  { %2164 = vsyncpa [#allocation10 + $0x1], 1 }
 0x67e   :  { %2165 = vsyncpa [#allocation12], 1 }
 0x67f   :  { %2166 = vsyncpa [#allocation15], 1 }
 0x680   :  { %2167 = vsyncmov [#allocation6] }
 0x683   :  { %s2168_s25 = vpop.sfrf %2167 }
 0x684   :  { %p2517_p0 = scmp.ne.s32.totalorder %s2168_s25, 0 }
 0x686   :  { %2172 = shalt.err (%p2517_p0)  }
 0x687   :  { %2174 = vsyncmov [#allocation6 + $0x1] }
 0x68a   :  { %s2175_s10 = vpop.sfrf %2174 }
 0x68b   :  { %p2518_p5 = scmp.ne.s32.totalorder %s2175_s10, 0 }
 0x68d   :  { %2179 = shalt.err (%p2518_p5)  }
 0x68e   :  { %2181 = vsyncmov [#allocation6 + $0x2] }
 0x691   :  { %s2182_s28 = vpop.sfrf %2181 }
 0x692   :  { %p2519_p3 = scmp.ne.s32.totalorder %s2182_s28, 0 }
 0x694   :  { %2186 = shalt.err (%p2519_p3)  }
 0x695   :  { %2188 = vsyncmov [#allocation6 + $0x3] }
 0x698   :  { %s2189_s17 = vpop.sfrf %2188 }
 0x699   :  { %p2520_p12 = scmp.ne.s32.totalorder %s2189_s17, 0 }
 0x69b   :  { %2193 = shalt.err (%p2520_p12)  }
 0x69c   :  { %2195 = vsyncmov [#allocation6 + $0x4] }
 0x69f   :  { %s2196_s1 = vpop.sfrf %2195 }
 0x6a0   :  { %p2521_p11 = scmp.ne.s32.totalorder %s2196_s1, 0 }
 0x6a2   :  { %2200 = shalt.err (%p2521_p11)  }
 0x6a3   :  { %2202 = vsyncmov [#allocation6 + $0x5] }
 0x6a6   :  { %s2203_s4 = vpop.sfrf %2202 }
 0x6a7   :  { %p2522_p2 = scmp.ne.s32.totalorder %s2203_s4, 0 }
 0x6a9   :  { %2207 = shalt.err (%p2522_p2)  }
 0x6aa   :  { %2209 = vsyncmov [#allocation6 + $0x6] }
 0x6ad   :  { %s2210_s5 = vpop.sfrf %2209 }
 0x6ae   :  { %p2523_p4 = scmp.ne.s32.totalorder %s2210_s5, 0 }
 0x6b0   :  { %2214 = shalt.err (%p2523_p4)  }
 0x6b1   :  { %2216 = vsyncmov [#allocation6 + $0x7] }
 0x6b4   :  { %s2217_s6 = vpop.sfrf %2216 }
 0x6b5   :  { %p2524_p10 = scmp.ne.s32.totalorder %s2217_s6, 0 }
 0x6b7   :  { %2221 = shalt.err (%p2524_p10)  }

</bundles_post_ra>
